<compile_context>
chip_gen: v5e
topology: v5e:2x2
jax: 0.10.0
libtpu: 0.0.40
codegen_flags: <defaults>
</compile_context>

<pallas_src>
import functools

import jax
import jax.numpy as jnp
from jax import lax
from jax.experimental import pallas as pl
from jax.experimental.pallas import tpu as pltpu


# ----------------------------------------------------------------------------
# helpers
# ----------------------------------------------------------------------------
def _layer_norm(x, g, b, eps=1e-12):
    mu = jnp.mean(x, axis=-1, keepdims=True)
    var = jnp.mean((x - mu) ** 2, axis=-1, keepdims=True)
    return (x - mu) * lax.rsqrt(var + eps) * g + b


def _vmem_limit_bytes():
    # ~75% of physical VMEM, capped at 110 MiB: ~96 MiB on v5e/v6e (128 MiB),
    # ~48 MiB on v7x (64 MiB).  Fallback is safe on every generation.
    try:
        cap = pltpu.get_tpu_info().vmem_capacity_bytes
    except Exception:  # pragma: no cover - conservative fallback
        cap = 64 * 1024 * 1024
    return min((int(cap) * 3) // 4, 110 * 1024 * 1024)


# ----------------------------------------------------------------------------
# Pallas kernel: full L-layer XLM encoder stack + regression head + MSE loss
# grid = (L,), activation carried in VMEM scratch across the layer axis.
# ----------------------------------------------------------------------------
def xlm_stack_kernel(x_hbm_ref, mask_ref, labels_ref,
                     wqkv_ref, bqkv_ref, wo_ref, bo_ref,
                     g1_ref, be1_ref,
                     w1_ref, bf1_ref, w2_ref, bf2_ref,
                     g2_ref, be2_ref,
                     ws_ref, bs_ref,
                     logits_ref, loss_ref,
                     x_sc, ctx_sc,
                     *, num_heads, batch, seq):
    l = pl.program_id(0)

    # Load the embedded input into the persistent VMEM activation once (layer 0).
    # x is layer-invariant, so it lives in HBM (memory_space=pl.ANY) and never
    # pays for a 2-deep pipeline buffer.
    @pl.when(l == 0)
    def _():
        pltpu.sync_copy(x_hbm_ref, x_sc)

    x = x_sc[...]                               # (B*S, D) float32
    BS, D = x.shape
    dh = D // num_heads
    scale = 1.0 / (dh ** 0.5)

    # Additive key bias built in-kernel from the (B, S) mask: 0 attend / -1e9 pad.
    key_bias = (mask_ref[...] - 1.0) * 1e9      # (B, S) float32

    # ---- fused QKV projection (single bf16 MXU matmul, f32 accumulate) ----
    xb = x.astype(jnp.bfloat16)
    qkv = jnp.dot(xb, wqkv_ref[0],
                  preferred_element_type=jnp.float32) + bqkv_ref[0]   # (BS, 3D)
    # Cast + reshape ONCE before the head loop (no per-slice casts).
    qkv_b = qkv.reshape(batch, seq, 3 * D).astype(jnp.bfloat16)       # (B, S, 3D)

    # ---- multi-head attention, per sequence (S x S scores, no cross-batch) ----
    for h in range(num_heads):
        q_h = qkv_b[:, :, h * dh:(h + 1) * dh]                        # (B, S, dh)
        k_h = qkv_b[:, :, D + h * dh:D + (h + 1) * dh]
        v_h = qkv_b[:, :, 2 * D + h * dh:2 * D + (h + 1) * dh]
        s = jnp.einsum('bqd,bkd->bqk', q_h, k_h,
                       preferred_element_type=jnp.float32) * scale    # (B, S, S)
        s = s + key_bias[:, None, :]
        m = jnp.max(s, axis=-1, keepdims=True)
        e = jnp.exp(s - m)
        # approx reciprocal on the EUP slot; ~1e-3 rel. error in probs.
        p = e * pl.reciprocal(jnp.sum(e, axis=-1, keepdims=True), approx=True)
        ctx = jnp.einsum('bqk,bkd->bqd', p.astype(jnp.bfloat16), v_h,
                         preferred_element_type=jnp.float32)          # (B, S, dh)
        ctx_sc[:, h * dh:(h + 1) * dh] = ctx.reshape(BS, dh).astype(jnp.bfloat16)

    # Single full-K output projection (one (BS,D)@(D,D) MXU matmul).
    attn = jnp.dot(ctx_sc[...], wo_ref[0],
                   preferred_element_type=jnp.float32) + bo_ref[0]

    x = _layer_norm(x + attn, g1_ref[0], be1_ref[0])

    # ---- feed-forward ----
    hmid = jnp.dot(x.astype(jnp.bfloat16), w1_ref[0],
                   preferred_element_type=jnp.float32) + bf1_ref[0]
    # TODO(synk): XLM uses exact-erf GELU; tanh approximation used here.
    hmid = jax.nn.gelu(hmid, approximate=True)
    y = jnp.dot(hmid.astype(jnp.bfloat16), w2_ref[0],
                preferred_element_type=jnp.float32) + bf2_ref[0]
    x = _layer_norm(x + y, g2_ref[0], be2_ref[0])

    # carry activation to the next layer (stays in VMEM, never hits HBM)
    x_sc[...] = x

    # ---- regression head + MSE loss fused into the last layer epilogue ----
    @pl.when(l == pl.num_programs(0) - 1)
    def _():
        # summary_type='first': token 0 of each sequence via one strided read.
        h0 = x_sc[pl.ds(0, batch, stride=seq), :]                      # (B, D)
        logits = jnp.sum(h0 * ws_ref[...], axis=-1, keepdims=True) + bs_ref[...]
        logits_ref[...] = logits                                       # (B, 1)
        diff = logits - labels_ref[...]
        loss_ref[...] = jnp.sum(diff * diff, axis=0, keepdims=True) * (1.0 / batch)


def xlm_stack(x_flat, mask01, labels2d, sp, num_heads, batch, seq):
    BS, D = x_flat.shape
    L, _, threeD = sp["wqkv"].shape
    F = sp["wff1"].shape[2]

    def wspec(shape):                       # per-layer stacked weight block
        return pl.BlockSpec(shape, lambda l: (l, 0, 0))

    in_specs = [
        pl.BlockSpec(memory_space=pl.ANY),              # embedded input (HBM)
        pl.BlockSpec((batch, seq), lambda l: (0, 0)),   # attention mask (B, S)
        pl.BlockSpec((batch, 1), lambda l: (0, 0)),     # labels
        wspec((1, D, threeD)), wspec((1, 1, threeD)),   # wqkv, bqkv
        wspec((1, D, D)), wspec((1, 1, D)),             # wo, bo
        wspec((1, 1, D)), wspec((1, 1, D)),             # ln1 gamma / beta
        wspec((1, D, F)), wspec((1, 1, F)),             # ffn in
        wspec((1, F, D)), wspec((1, 1, D)),             # ffn out
        wspec((1, 1, D)), wspec((1, 1, D)),             # ln2 gamma / beta
        pl.BlockSpec((1, D), lambda l: (0, 0)),         # ws (regression weight)
        pl.BlockSpec((1, 1), lambda l: (0, 0)),         # bs
    ]
    out_specs = (pl.BlockSpec((batch, 1), lambda l: (0, 0)),
                 pl.BlockSpec((1, 1), lambda l: (0, 0)))
    out_shape = (jax.ShapeDtypeStruct((batch, 1), jnp.float32),
                 jax.ShapeDtypeStruct((1, 1), jnp.float32))

    return pl.pallas_call(
        functools.partial(xlm_stack_kernel,
                          num_heads=num_heads, batch=batch, seq=seq),
        grid=(L,),
        in_specs=in_specs,
        out_specs=out_specs,
        out_shape=out_shape,
        scratch_shapes=[pltpu.VMEM((BS, D), jnp.float32),     # activation carry
                        pltpu.VMEM((BS, D), jnp.bfloat16)],   # attention context
        compiler_params=pltpu.CompilerParams(
            dimension_semantics=("arbitrary",),               # layer carry is sequential
            vmem_limit_bytes=_vmem_limit_bytes()),
    )(x_flat, mask01, labels2d,
      sp["wqkv"], sp["bqkv"], sp["wo"], sp["bo"],
      sp["ln1_g"], sp["ln1_b"],
      sp["wff1"], sp["bff1"], sp["wff2"], sp["bff2"],
      sp["ln2_g"], sp["ln2_b"],
      sp["ws"], sp["bs"])


# ----------------------------------------------------------------------------
# parameter init (deterministic; synthetic weights — no checkpoint load)
# Matmul weights are stored bf16 (halves HBM->VMEM bytes); biases / LN stay f32.
# ----------------------------------------------------------------------------
def init_params(key, vocab, max_pos, D, F, n_layers):
    std = 0.02
    L = n_layers
    ks = jax.random.split(key, 8)
    params = {
        "word_emb": std * jax.random.normal(ks[0], (vocab, D), jnp.float32),
        "pos_emb": std * jax.random.normal(ks[1], (max_pos, D), jnp.float32),
        "ln_emb_g": jnp.ones((1, 1, D), jnp.float32),
        "ln_emb_b": jnp.zeros((1, 1, D), jnp.float32),
        "stack": {
            "wqkv": (std * jax.random.normal(ks[2], (L, D, 3 * D), jnp.float32)
                     ).astype(jnp.bfloat16),
            "bqkv": jnp.zeros((L, 1, 3 * D), jnp.float32),
            "wo": (std * jax.random.normal(ks[3], (L, D, D), jnp.float32)
                   ).astype(jnp.bfloat16),
            "bo": jnp.zeros((L, 1, D), jnp.float32),
            "ln1_g": jnp.ones((L, 1, D), jnp.float32),
            "ln1_b": jnp.zeros((L, 1, D), jnp.float32),
            "wff1": (std * jax.random.normal(ks[4], (L, D, F), jnp.float32)
                     ).astype(jnp.bfloat16),
            "bff1": jnp.zeros((L, 1, F), jnp.float32),
            "wff2": (std * jax.random.normal(ks[5], (L, F, D), jnp.float32)
                     ).astype(jnp.bfloat16),
            "bff2": jnp.zeros((L, 1, D), jnp.float32),
            "ln2_g": jnp.ones((L, 1, D), jnp.float32),
            "ln2_b": jnp.zeros((L, 1, D), jnp.float32),
            "ws": std * jax.random.normal(ks[6], (1, D), jnp.float32),
            "bs": jnp.zeros((1, 1), jnp.float32),
        },
    }
    return params


# ----------------------------------------------------------------------------
# full forward: (loss, logits) like the PyTorch module
# ----------------------------------------------------------------------------
def forward(params, input_ids, attention_mask, token_type_ids, labels,
            num_heads):
    B, S = input_ids.shape
    we, pe = params["word_emb"], params["pos_emb"]
    D = we.shape[1]

    # Embedding glue (gathers) in plain JAX.
    # TODO(synk): real XLM has a separate language/token-type embedding table;
    # token_type_ids reuse the word table here (synthetic weights).
    x = we[input_ids] + pe[jnp.arange(S)][None, :, :] + we[token_type_ids]
    x = _layer_norm(x, params["ln_emb_g"], params["ln_emb_b"])
    x_flat = x.reshape(B * S, D).astype(jnp.float32)

    # Only the tiny (B, S) key-valid mask goes to the kernel; the additive
    # block-diagonal bias is implicit in the per-sequence attention.
    mask01 = attention_mask.astype(jnp.float32)

    labels2d = labels.reshape(B, 1).astype(jnp.float32)

    logits, loss = xlm_stack(x_flat, mask01, labels2d, params["stack"],
                             num_heads, B, S)
    return loss[0, 0], logits


if __name__ == "__main__":
    B, S, D, H, F, L = 2, 8, 128, 4, 512, 2
    VOCAB, MAX_POS = 64, 32

    root = jax.random.PRNGKey(0)
    kp, k_ids, k_lab = jax.random.split(root, 3)

    params = init_params(kp, VOCAB, MAX_POS, D, F, L)

    input_ids = jax.random.randint(k_ids, (B, S), 0, VOCAB, dtype=jnp.int32)
    attention_mask = jnp.ones((B, S), jnp.int32).at[1, 6:].set(0)  # pad tail of seq 1
    token_type_ids = jnp.zeros((B, S), jnp.int32)
    labels = jax.random.normal(k_lab, (B,), jnp.float32)

    fwd = jax.jit(functools.partial(forward, num_heads=H))
    loss, logits = fwd(params, input_ids, attention_mask, token_type_ids, labels)
    jax.block_until_ready((loss, logits))

    assert logits.shape == (B, 1) and loss.shape == ()
    print("KERNEL_OK")
</pallas_src>

<mosaic_0001>
module attributes {stable_mosaic.version = 11 : i64} {
  func.func @xlm_stack_kernel(%arg0: i32, %arg1: memref<16x128xf32, #tpu.memory_space<any>>, %arg2: memref<2x8xf32, #tpu.memory_space<vmem>>, %arg3: memref<2x1xf32, #tpu.memory_space<vmem>>, %arg4: memref<1x128x384xbf16, #tpu.memory_space<vmem>>, %arg5: memref<1x1x384xf32, #tpu.memory_space<vmem>>, %arg6: memref<1x128x128xbf16, #tpu.memory_space<vmem>>, %arg7: memref<1x1x128xf32, #tpu.memory_space<vmem>>, %arg8: memref<1x1x128xf32, #tpu.memory_space<vmem>>, %arg9: memref<1x1x128xf32, #tpu.memory_space<vmem>>, %arg10: memref<1x128x512xbf16, #tpu.memory_space<vmem>>, %arg11: memref<1x1x512xf32, #tpu.memory_space<vmem>>, %arg12: memref<1x512x128xbf16, #tpu.memory_space<vmem>>, %arg13: memref<1x1x128xf32, #tpu.memory_space<vmem>>, %arg14: memref<1x1x128xf32, #tpu.memory_space<vmem>>, %arg15: memref<1x1x128xf32, #tpu.memory_space<vmem>>, %arg16: memref<1x128xf32, #tpu.memory_space<vmem>>, %arg17: memref<1x1xf32, #tpu.memory_space<vmem>>, %arg18: memref<2x1xf32, #tpu.memory_space<vmem>>, %arg19: memref<1x1xf32, #tpu.memory_space<vmem>>, %arg20: memref<16x128xf32, #tpu.memory_space<vmem>>, %arg21: memref<16x128xbf16, #tpu.memory_space<vmem>>) attributes {dimension_semantics = [#tpu.dimension_semantics<arbitrary>], iteration_bounds = array<i64: 2>, scalar_prefetch = 0 : i64, scratch_operands = 2 : i64, tpu.core_type = #tpu.core_type<tc>, window_params = [{}, {pipeline_mode = #tpu.pipeline_mode<synchronous>, transform_indices = @transform_1, window_bounds = array<i64: 2, 8>}, {pipeline_mode = #tpu.pipeline_mode<synchronous>, transform_indices = @transform_2, window_bounds = array<i64: 2, 1>}, {transform_indices = @transform_3, window_bounds = array<i64: 1, 128, 384>}, {transform_indices = @transform_4, window_bounds = array<i64: 1, 1, 384>}, {transform_indices = @transform_5, window_bounds = array<i64: 1, 128, 128>}, {transform_indices = @transform_6, window_bounds = array<i64: 1, 1, 128>}, {transform_indices = @transform_7, window_bounds = array<i64: 1, 1, 128>}, {transform_indices = @transform_8, window_bounds = array<i64: 1, 1, 128>}, {transform_indices = @transform_9, window_bounds = array<i64: 1, 128, 512>}, {transform_indices = @transform_10, window_bounds = array<i64: 1, 1, 512>}, {transform_indices = @transform_11, window_bounds = array<i64: 1, 512, 128>}, {transform_indices = @transform_12, window_bounds = array<i64: 1, 1, 128>}, {transform_indices = @transform_13, window_bounds = array<i64: 1, 1, 128>}, {transform_indices = @transform_14, window_bounds = array<i64: 1, 1, 128>}, {pipeline_mode = #tpu.pipeline_mode<synchronous>, transform_indices = @transform_15, window_bounds = array<i64: 1, 128>}, {pipeline_mode = #tpu.pipeline_mode<synchronous>, transform_indices = @transform_16, window_bounds = array<i64: 1, 1>}, {pipeline_mode = #tpu.pipeline_mode<synchronous>, transform_indices = @transform_17, window_bounds = array<i64: 2, 1>}, {pipeline_mode = #tpu.pipeline_mode<synchronous>, transform_indices = @transform_18, window_bounds = array<i64: 1, 1>}]} {
    %c0_i32 = arith.constant 0 : i32
    %0 = arith.cmpi eq, %arg0, %c0_i32 : i32
    %1 = arith.extui %0 : i1 to i32
    %c0_i32_0 = arith.constant 0 : i32
    %2 = arith.cmpi ne, %1, %c0_i32_0 : i32
    scf.if %2 {
      "tpu.region"() ({
        %210 = tpu.sem_alloc : memref<!tpu.dma_semaphore, #tpu.memory_space<semaphore_mem>>
        tpu.enqueue_dma source(%arg1 : memref<16x128xf32, #tpu.memory_space<any>>) target(%arg20 : memref<16x128xf32, #tpu.memory_space<vmem>>) target_semaphore(%210 : memref<!tpu.dma_semaphore, #tpu.memory_space<semaphore_mem>>)
        tpu.wait_dma2 semaphore(%210 : memref<!tpu.dma_semaphore, #tpu.memory_space<semaphore_mem>>) src(%arg1 : memref<16x128xf32, #tpu.memory_space<any>>) dst(%arg20 : memref<16x128xf32, #tpu.memory_space<vmem>>)
        tpu.yield
      }) : () -> ()
    } else {
    }
    %c0 = arith.constant 0 : index
    %c0_1 = arith.constant 0 : index
    %3 = vector.load %arg20[%c0, %c0_1] : memref<16x128xf32, #tpu.memory_space<vmem>>, vector<16x128xf32>
    %c0_2 = arith.constant 0 : index
    %c0_3 = arith.constant 0 : index
    %4 = vector.load %arg2[%c0_2, %c0_3] : memref<2x8xf32, #tpu.memory_space<vmem>>, vector<2x8xf32>
    %cst = arith.constant 1.000000e+00 : f32
    %5 = vector.broadcast %cst : f32 to vector<2x8xf32>
    %6 = arith.subf %4, %5 : vector<2x8xf32>
    %cst_4 = arith.constant 1.000000e+09 : f32
    %7 = vector.broadcast %cst_4 : f32 to vector<2x8xf32>
    %8 = arith.mulf %6, %7 : vector<2x8xf32>
    %9 = arith.truncf %3 : vector<16x128xf32> to vector<16x128xbf16>
    %c0_5 = arith.constant 0 : index
    %c0_6 = arith.constant 0 : index
    %c0_7 = arith.constant 0 : index
    %10 = vector.load %arg4[%c0_5, %c0_6, %c0_7] : memref<1x128x384xbf16, #tpu.memory_space<vmem>>, vector<1x128x384xbf16>
    %11 = vector.shape_cast %10 : vector<1x128x384xbf16> to vector<128x384xbf16>
    %cst_8 = arith.constant dense<0.000000e+00> : vector<16x384xf32>
    %12 = tpu.matmul %9, %11, %cst_8 {dimension_numbers = #tpu.dot_dimension_numbers<[1], [0], [0], [1], [0, 0, 1, 1], [], []>} : vector<16x128xbf16>, vector<128x384xbf16>, vector<16x384xf32> -> vector<16x384xf32>
    %c0_9 = arith.constant 0 : index
    %c0_10 = arith.constant 0 : index
    %c0_11 = arith.constant 0 : index
    %13 = vector.load %arg5[%c0_9, %c0_10, %c0_11] : memref<1x1x384xf32, #tpu.memory_space<vmem>>, vector<1x1x384xf32>
    %14 = vector.shape_cast %13 : vector<1x1x384xf32> to vector<1x384xf32>
    %15 = vector.broadcast %14 : vector<1x384xf32> to vector<16x384xf32>
    %16 = arith.addf %12, %15 : vector<16x384xf32>
    %17 = vector.shape_cast %16 : vector<16x384xf32> to vector<2x8x384xf32>
    %18 = arith.truncf %17 : vector<2x8x384xf32> to vector<2x8x384xbf16>
    %19 = vector.extract_strided_slice %18 {offsets = [0, 0, 0], sizes = [2, 8, 32], strides = [1, 1, 1]} : vector<2x8x384xbf16> to vector<2x8x32xbf16>
    %20 = vector.extract_strided_slice %18 {offsets = [0, 0, 128], sizes = [2, 8, 32], strides = [1, 1, 1]} : vector<2x8x384xbf16> to vector<2x8x32xbf16>
    %21 = vector.extract_strided_slice %18 {offsets = [0, 0, 256], sizes = [2, 8, 32], strides = [1, 1, 1]} : vector<2x8x384xbf16> to vector<2x8x32xbf16>
    "tpu.trace_start"() <{level = 10 : i32, message = "bqd,bkd->bqk"}> : () -> ()
    %cst_12 = arith.constant dense<0.000000e+00> : vector<2x8x8xf32>
    %22 = tpu.matmul %19, %20, %cst_12 {dimension_numbers = #tpu.dot_dimension_numbers<[2], [2], [1], [1], [0, 0, 0, 1, 1, 1], [0], [0]>} : vector<2x8x32xbf16>, vector<2x8x32xbf16>, vector<2x8x8xf32> -> vector<2x8x8xf32>
    "tpu.trace_stop"() : () -> ()
    %cst_13 = arith.constant 0.176776692 : f32
    %23 = vector.broadcast %cst_13 : f32 to vector<2x8x8xf32>
    %24 = arith.mulf %22, %23 : vector<2x8x8xf32>
    %25 = vector.shape_cast %8 : vector<2x8xf32> to vector<2x1x8xf32>
    %26 = vector.broadcast %25 : vector<2x1x8xf32> to vector<2x8x8xf32>
    %27 = arith.addf %24, %26 : vector<2x8x8xf32>
    %cst_14 = arith.constant dense<0xFF800000> : vector<2x8xf32>
    %28 = vector.multi_reduction <maximumf>, %27, %cst_14 [2] : vector<2x8x8xf32> to vector<2x8xf32>
    %29 = vector.shape_cast %28 : vector<2x8xf32> to vector<2x8x1xf32>
    %30 = vector.broadcast %29 : vector<2x8x1xf32> to vector<2x8x8xf32>
    %31 = arith.subf %27, %30 : vector<2x8x8xf32>
    %32 = math.exp %31 : vector<2x8x8xf32>
    %cst_15 = arith.constant dense<0.000000e+00> : vector<2x8xf32>
    %33 = vector.multi_reduction <add>, %32, %cst_15 [2] : vector<2x8x8xf32> to vector<2x8xf32>
    %34 = vector.shape_cast %33 : vector<2x8xf32> to vector<2x8x1xf32>
    %35 = tpu.reciprocal %34 {approx = true} : vector<2x8x1xf32> -> vector<2x8x1xf32>
    %36 = vector.broadcast %35 : vector<2x8x1xf32> to vector<2x8x8xf32>
    %37 = arith.mulf %32, %36 : vector<2x8x8xf32>
    %38 = arith.truncf %37 : vector<2x8x8xf32> to vector<2x8x8xbf16>
    "tpu.trace_start"() <{level = 10 : i32, message = "bqk,bkd->bqd"}> : () -> ()
    %cst_16 = arith.constant dense<0.000000e+00> : vector<2x8x32xf32>
    %39 = tpu.matmul %38, %21, %cst_16 {dimension_numbers = #tpu.dot_dimension_numbers<[2], [1], [1], [2], [0, 0, 0, 1, 1, 2], [0], [0]>} : vector<2x8x8xbf16>, vector<2x8x32xbf16>, vector<2x8x32xf32> -> vector<2x8x32xf32>
    "tpu.trace_stop"() : () -> ()
    %40 = vector.shape_cast %39 : vector<2x8x32xf32> to vector<16x32xf32>
    %41 = arith.truncf %40 : vector<16x32xf32> to vector<16x32xbf16>
    %c0_17 = arith.constant 0 : index
    %c0_18 = arith.constant 0 : index
    %42 = vector.load %arg21[%c0_17, %c0_18] : memref<16x128xbf16, #tpu.memory_space<vmem>>, vector<16x32xbf16>
    tpu.vector_store %arg21[%c0_17, %c0_18], %41 {strides = array<i32>} : memref<16x128xbf16, #tpu.memory_space<vmem>>, vector<16x32xbf16>,
    %43 = vector.extract_strided_slice %18 {offsets = [0, 0, 32], sizes = [2, 8, 32], strides = [1, 1, 1]} : vector<2x8x384xbf16> to vector<2x8x32xbf16>
    %44 = vector.extract_strided_slice %18 {offsets = [0, 0, 160], sizes = [2, 8, 32], strides = [1, 1, 1]} : vector<2x8x384xbf16> to vector<2x8x32xbf16>
    %45 = vector.extract_strided_slice %18 {offsets = [0, 0, 288], sizes = [2, 8, 32], strides = [1, 1, 1]} : vector<2x8x384xbf16> to vector<2x8x32xbf16>
    "tpu.trace_start"() <{level = 10 : i32, message = "bqd,bkd->bqk"}> : () -> ()
    %cst_19 = arith.constant dense<0.000000e+00> : vector<2x8x8xf32>
    %46 = tpu.matmul %43, %44, %cst_19 {dimension_numbers = #tpu.dot_dimension_numbers<[2], [2], [1], [1], [0, 0, 0, 1, 1, 1], [0], [0]>} : vector<2x8x32xbf16>, vector<2x8x32xbf16>, vector<2x8x8xf32> -> vector<2x8x8xf32>
    "tpu.trace_stop"() : () -> ()
    %cst_20 = arith.constant 0.176776692 : f32
    %47 = vector.broadcast %cst_20 : f32 to vector<2x8x8xf32>
    %48 = arith.mulf %46, %47 : vector<2x8x8xf32>
    %49 = vector.shape_cast %8 : vector<2x8xf32> to vector<2x1x8xf32>
    %50 = vector.broadcast %49 : vector<2x1x8xf32> to vector<2x8x8xf32>
    %51 = arith.addf %48, %50 : vector<2x8x8xf32>
    %cst_21 = arith.constant dense<0xFF800000> : vector<2x8xf32>
    %52 = vector.multi_reduction <maximumf>, %51, %cst_21 [2] : vector<2x8x8xf32> to vector<2x8xf32>
    %53 = vector.shape_cast %52 : vector<2x8xf32> to vector<2x8x1xf32>
    %54 = vector.broadcast %53 : vector<2x8x1xf32> to vector<2x8x8xf32>
    %55 = arith.subf %51, %54 : vector<2x8x8xf32>
    %56 = math.exp %55 : vector<2x8x8xf32>
    %cst_22 = arith.constant dense<0.000000e+00> : vector<2x8xf32>
    %57 = vector.multi_reduction <add>, %56, %cst_22 [2] : vector<2x8x8xf32> to vector<2x8xf32>
    %58 = vector.shape_cast %57 : vector<2x8xf32> to vector<2x8x1xf32>
    %59 = tpu.reciprocal %58 {approx = true} : vector<2x8x1xf32> -> vector<2x8x1xf32>
    %60 = vector.broadcast %59 : vector<2x8x1xf32> to vector<2x8x8xf32>
    %61 = arith.mulf %56, %60 : vector<2x8x8xf32>
    %62 = arith.truncf %61 : vector<2x8x8xf32> to vector<2x8x8xbf16>
    "tpu.trace_start"() <{level = 10 : i32, message = "bqk,bkd->bqd"}> : () -> ()
    %cst_23 = arith.constant dense<0.000000e+00> : vector<2x8x32xf32>
    %63 = tpu.matmul %62, %45, %cst_23 {dimension_numbers = #tpu.dot_dimension_numbers<[2], [1], [1], [2], [0, 0, 0, 1, 1, 2], [0], [0]>} : vector<2x8x8xbf16>, vector<2x8x32xbf16>, vector<2x8x32xf32> -> vector<2x8x32xf32>
    "tpu.trace_stop"() : () -> ()
    %64 = vector.shape_cast %63 : vector<2x8x32xf32> to vector<16x32xf32>
    %65 = arith.truncf %64 : vector<16x32xf32> to vector<16x32xbf16>
    %c0_24 = arith.constant 0 : index
    %c32 = arith.constant 32 : index
    %66 = vector.load %arg21[%c0_24, %c32] : memref<16x128xbf16, #tpu.memory_space<vmem>>, vector<16x32xbf16>
    tpu.vector_store %arg21[%c0_24, %c32], %65 {strides = array<i32>} : memref<16x128xbf16, #tpu.memory_space<vmem>>, vector<16x32xbf16>,
    %67 = vector.extract_strided_slice %18 {offsets = [0, 0, 64], sizes = [2, 8, 32], strides = [1, 1, 1]} : vector<2x8x384xbf16> to vector<2x8x32xbf16>
    %68 = vector.extract_strided_slice %18 {offsets = [0, 0, 192], sizes = [2, 8, 32], strides = [1, 1, 1]} : vector<2x8x384xbf16> to vector<2x8x32xbf16>
    %69 = vector.extract_strided_slice %18 {offsets = [0, 0, 320], sizes = [2, 8, 32], strides = [1, 1, 1]} : vector<2x8x384xbf16> to vector<2x8x32xbf16>
    "tpu.trace_start"() <{level = 10 : i32, message = "bqd,bkd->bqk"}> : () -> ()
    %cst_25 = arith.constant dense<0.000000e+00> : vector<2x8x8xf32>
    %70 = tpu.matmul %67, %68, %cst_25 {dimension_numbers = #tpu.dot_dimension_numbers<[2], [2], [1], [1], [0, 0, 0, 1, 1, 1], [0], [0]>} : vector<2x8x32xbf16>, vector<2x8x32xbf16>, vector<2x8x8xf32> -> vector<2x8x8xf32>
    "tpu.trace_stop"() : () -> ()
    %cst_26 = arith.constant 0.176776692 : f32
    %71 = vector.broadcast %cst_26 : f32 to vector<2x8x8xf32>
    %72 = arith.mulf %70, %71 : vector<2x8x8xf32>
    %73 = vector.shape_cast %8 : vector<2x8xf32> to vector<2x1x8xf32>
    %74 = vector.broadcast %73 : vector<2x1x8xf32> to vector<2x8x8xf32>
    %75 = arith.addf %72, %74 : vector<2x8x8xf32>
    %cst_27 = arith.constant dense<0xFF800000> : vector<2x8xf32>
    %76 = vector.multi_reduction <maximumf>, %75, %cst_27 [2] : vector<2x8x8xf32> to vector<2x8xf32>
    %77 = vector.shape_cast %76 : vector<2x8xf32> to vector<2x8x1xf32>
    %78 = vector.broadcast %77 : vector<2x8x1xf32> to vector<2x8x8xf32>
    %79 = arith.subf %75, %78 : vector<2x8x8xf32>
    %80 = math.exp %79 : vector<2x8x8xf32>
    %cst_28 = arith.constant dense<0.000000e+00> : vector<2x8xf32>
    %81 = vector.multi_reduction <add>, %80, %cst_28 [2] : vector<2x8x8xf32> to vector<2x8xf32>
    %82 = vector.shape_cast %81 : vector<2x8xf32> to vector<2x8x1xf32>
    %83 = tpu.reciprocal %82 {approx = true} : vector<2x8x1xf32> -> vector<2x8x1xf32>
    %84 = vector.broadcast %83 : vector<2x8x1xf32> to vector<2x8x8xf32>
    %85 = arith.mulf %80, %84 : vector<2x8x8xf32>
    %86 = arith.truncf %85 : vector<2x8x8xf32> to vector<2x8x8xbf16>
    "tpu.trace_start"() <{level = 10 : i32, message = "bqk,bkd->bqd"}> : () -> ()
    %cst_29 = arith.constant dense<0.000000e+00> : vector<2x8x32xf32>
    %87 = tpu.matmul %86, %69, %cst_29 {dimension_numbers = #tpu.dot_dimension_numbers<[2], [1], [1], [2], [0, 0, 0, 1, 1, 2], [0], [0]>} : vector<2x8x8xbf16>, vector<2x8x32xbf16>, vector<2x8x32xf32> -> vector<2x8x32xf32>
    "tpu.trace_stop"() : () -> ()
    %88 = vector.shape_cast %87 : vector<2x8x32xf32> to vector<16x32xf32>
    %89 = arith.truncf %88 : vector<16x32xf32> to vector<16x32xbf16>
    %c0_30 = arith.constant 0 : index
    %c64 = arith.constant 64 : index
    %90 = vector.load %arg21[%c0_30, %c64] : memref<16x128xbf16, #tpu.memory_space<vmem>>, vector<16x32xbf16>
    tpu.vector_store %arg21[%c0_30, %c64], %89 {strides = array<i32>} : memref<16x128xbf16, #tpu.memory_space<vmem>>, vector<16x32xbf16>,
    %91 = vector.extract_strided_slice %18 {offsets = [0, 0, 96], sizes = [2, 8, 32], strides = [1, 1, 1]} : vector<2x8x384xbf16> to vector<2x8x32xbf16>
    %92 = vector.extract_strided_slice %18 {offsets = [0, 0, 224], sizes = [2, 8, 32], strides = [1, 1, 1]} : vector<2x8x384xbf16> to vector<2x8x32xbf16>
    %93 = vector.extract_strided_slice %18 {offsets = [0, 0, 352], sizes = [2, 8, 32], strides = [1, 1, 1]} : vector<2x8x384xbf16> to vector<2x8x32xbf16>
    "tpu.trace_start"() <{level = 10 : i32, message = "bqd,bkd->bqk"}> : () -> ()
    %cst_31 = arith.constant dense<0.000000e+00> : vector<2x8x8xf32>
    %94 = tpu.matmul %91, %92, %cst_31 {dimension_numbers = #tpu.dot_dimension_numbers<[2], [2], [1], [1], [0, 0, 0, 1, 1, 1], [0], [0]>} : vector<2x8x32xbf16>, vector<2x8x32xbf16>, vector<2x8x8xf32> -> vector<2x8x8xf32>
    "tpu.trace_stop"() : () -> ()
    %cst_32 = arith.constant 0.176776692 : f32
    %95 = vector.broadcast %cst_32 : f32 to vector<2x8x8xf32>
    %96 = arith.mulf %94, %95 : vector<2x8x8xf32>
    %97 = vector.shape_cast %8 : vector<2x8xf32> to vector<2x1x8xf32>
    %98 = vector.broadcast %97 : vector<2x1x8xf32> to vector<2x8x8xf32>
    %99 = arith.addf %96, %98 : vector<2x8x8xf32>
    %cst_33 = arith.constant dense<0xFF800000> : vector<2x8xf32>
    %100 = vector.multi_reduction <maximumf>, %99, %cst_33 [2] : vector<2x8x8xf32> to vector<2x8xf32>
    %101 = vector.shape_cast %100 : vector<2x8xf32> to vector<2x8x1xf32>
    %102 = vector.broadcast %101 : vector<2x8x1xf32> to vector<2x8x8xf32>
    %103 = arith.subf %99, %102 : vector<2x8x8xf32>
    %104 = math.exp %103 : vector<2x8x8xf32>
    %cst_34 = arith.constant dense<0.000000e+00> : vector<2x8xf32>
    %105 = vector.multi_reduction <add>, %104, %cst_34 [2] : vector<2x8x8xf32> to vector<2x8xf32>
    %106 = vector.shape_cast %105 : vector<2x8xf32> to vector<2x8x1xf32>
    %107 = tpu.reciprocal %106 {approx = true} : vector<2x8x1xf32> -> vector<2x8x1xf32>
    %108 = vector.broadcast %107 : vector<2x8x1xf32> to vector<2x8x8xf32>
    %109 = arith.mulf %104, %108 : vector<2x8x8xf32>
    %110 = arith.truncf %109 : vector<2x8x8xf32> to vector<2x8x8xbf16>
    "tpu.trace_start"() <{level = 10 : i32, message = "bqk,bkd->bqd"}> : () -> ()
    %cst_35 = arith.constant dense<0.000000e+00> : vector<2x8x32xf32>
    %111 = tpu.matmul %110, %93, %cst_35 {dimension_numbers = #tpu.dot_dimension_numbers<[2], [1], [1], [2], [0, 0, 0, 1, 1, 2], [0], [0]>} : vector<2x8x8xbf16>, vector<2x8x32xbf16>, vector<2x8x32xf32> -> vector<2x8x32xf32>
    "tpu.trace_stop"() : () -> ()
    %112 = vector.shape_cast %111 : vector<2x8x32xf32> to vector<16x32xf32>
    %113 = arith.truncf %112 : vector<16x32xf32> to vector<16x32xbf16>
    %c0_36 = arith.constant 0 : index
    %c96 = arith.constant 96 : index
    %114 = vector.load %arg21[%c0_36, %c96] : memref<16x128xbf16, #tpu.memory_space<vmem>>, vector<16x32xbf16>
    tpu.vector_store %arg21[%c0_36, %c96], %113 {strides = array<i32>} : memref<16x128xbf16, #tpu.memory_space<vmem>>, vector<16x32xbf16>,
    %c0_37 = arith.constant 0 : index
    %c0_38 = arith.constant 0 : index
    %115 = vector.load %arg21[%c0_37, %c0_38] : memref<16x128xbf16, #tpu.memory_space<vmem>>, vector<16x128xbf16>
    %c0_39 = arith.constant 0 : index
    %c0_40 = arith.constant 0 : index
    %c0_41 = arith.constant 0 : index
    %116 = vector.load %arg6[%c0_39, %c0_40, %c0_41] : memref<1x128x128xbf16, #tpu.memory_space<vmem>>, vector<1x128x128xbf16>
    %117 = vector.shape_cast %116 : vector<1x128x128xbf16> to vector<128x128xbf16>
    %cst_42 = arith.constant dense<0.000000e+00> : vector<16x128xf32>
    %118 = tpu.matmul %115, %117, %cst_42 {dimension_numbers = #tpu.dot_dimension_numbers<[1], [0], [0], [1], [0, 0, 1, 1], [], []>} : vector<16x128xbf16>, vector<128x128xbf16>, vector<16x128xf32> -> vector<16x128xf32>
    %c0_43 = arith.constant 0 : index
    %c0_44 = arith.constant 0 : index
    %c0_45 = arith.constant 0 : index
    %119 = vector.load %arg7[%c0_43, %c0_44, %c0_45] : memref<1x1x128xf32, #tpu.memory_space<vmem>>, vector<1x1x128xf32>
    %120 = vector.shape_cast %119 : vector<1x1x128xf32> to vector<1x128xf32>
    %121 = vector.broadcast %120 : vector<1x128xf32> to vector<16x128xf32>
    %122 = arith.addf %118, %121 : vector<16x128xf32>
    %123 = arith.addf %3, %122 : vector<16x128xf32>
    %c0_46 = arith.constant 0 : index
    %c0_47 = arith.constant 0 : index
    %c0_48 = arith.constant 0 : index
    %124 = vector.load %arg8[%c0_46, %c0_47, %c0_48] : memref<1x1x128xf32, #tpu.memory_space<vmem>>, vector<1x1x128xf32>
    %125 = vector.shape_cast %124 : vector<1x1x128xf32> to vector<1x128xf32>
    %c0_49 = arith.constant 0 : index
    %c0_50 = arith.constant 0 : index
    %c0_51 = arith.constant 0 : index
    %126 = vector.load %arg9[%c0_49, %c0_50, %c0_51] : memref<1x1x128xf32, #tpu.memory_space<vmem>>, vector<1x1x128xf32>
    %127 = vector.shape_cast %126 : vector<1x1x128xf32> to vector<1x128xf32>
    %cst_52 = arith.constant dense<0.000000e+00> : vector<16xf32>
    %128 = vector.multi_reduction <add>, %123, %cst_52 [1] : vector<16x128xf32> to vector<16xf32>
    %129 = vector.shape_cast %128 : vector<16xf32> to vector<16x1xf32>
    %cst_53 = arith.constant 1.280000e+02 : f32
    %130 = vector.broadcast %cst_53 : f32 to vector<16x1xf32>
    %131 = arith.divf %129, %130 : vector<16x1xf32>
    %132 = vector.broadcast %131 : vector<16x1xf32> to vector<16x128xf32>
    %133 = arith.subf %123, %132 : vector<16x128xf32>
    %134 = arith.mulf %133, %133 : vector<16x128xf32>
    %cst_54 = arith.constant dense<0.000000e+00> : vector<16xf32>
    %135 = vector.multi_reduction <add>, %134, %cst_54 [1] : vector<16x128xf32> to vector<16xf32>
    %136 = vector.shape_cast %135 : vector<16xf32> to vector<16x1xf32>
    %cst_55 = arith.constant 1.280000e+02 : f32
    %137 = vector.broadcast %cst_55 : f32 to vector<16x1xf32>
    %138 = arith.divf %136, %137 : vector<16x1xf32>
    %139 = vector.broadcast %131 : vector<16x1xf32> to vector<16x128xf32>
    %140 = arith.subf %123, %139 : vector<16x128xf32>
    %cst_56 = arith.constant 9.99999996E-13 : f32
    %141 = vector.broadcast %cst_56 : f32 to vector<16x1xf32>
    %142 = arith.addf %138, %141 : vector<16x1xf32>
    %143 = math.rsqrt %142 : vector<16x1xf32>
    %144 = vector.broadcast %143 : vector<16x1xf32> to vector<16x128xf32>
    %145 = arith.mulf %140, %144 : vector<16x128xf32>
    %146 = vector.broadcast %125 : vector<1x128xf32> to vector<16x128xf32>
    %147 = arith.mulf %145, %146 : vector<16x128xf32>
    %148 = vector.broadcast %127 : vector<1x128xf32> to vector<16x128xf32>
    %149 = arith.addf %147, %148 : vector<16x128xf32>
    %150 = arith.truncf %149 : vector<16x128xf32> to vector<16x128xbf16>
    %c0_57 = arith.constant 0 : index
    %c0_58 = arith.constant 0 : index
    %c0_59 = arith.constant 0 : index
    %151 = vector.load %arg10[%c0_57, %c0_58, %c0_59] : memref<1x128x512xbf16, #tpu.memory_space<vmem>>, vector<1x128x512xbf16>
    %152 = vector.shape_cast %151 : vector<1x128x512xbf16> to vector<128x512xbf16>
    %cst_60 = arith.constant dense<0.000000e+00> : vector<16x512xf32>
    %153 = tpu.matmul %150, %152, %cst_60 {dimension_numbers = #tpu.dot_dimension_numbers<[1], [0], [0], [1], [0, 0, 1, 1], [], []>} : vector<16x128xbf16>, vector<128x512xbf16>, vector<16x512xf32> -> vector<16x512xf32>
    %c0_61 = arith.constant 0 : index
    %c0_62 = arith.constant 0 : index
    %c0_63 = arith.constant 0 : index
    %154 = vector.load %arg11[%c0_61, %c0_62, %c0_63] : memref<1x1x512xf32, #tpu.memory_space<vmem>>, vector<1x1x512xf32>
    %155 = vector.shape_cast %154 : vector<1x1x512xf32> to vector<1x512xf32>
    %156 = vector.broadcast %155 : vector<1x512xf32> to vector<16x512xf32>
    %157 = arith.addf %153, %156 : vector<16x512xf32>
    %158 = arith.mulf %157, %157 : vector<16x512xf32>
    %159 = arith.mulf %157, %158 : vector<16x512xf32>
    %cst_64 = arith.constant 4.471500e-02 : f32
    %160 = vector.broadcast %cst_64 : f32 to vector<16x512xf32>
    %161 = arith.mulf %160, %159 : vector<16x512xf32>
    %162 = arith.addf %157, %161 : vector<16x512xf32>
    %cst_65 = arith.constant 0.797884583 : f32
    %163 = vector.broadcast %cst_65 : f32 to vector<16x512xf32>
    %164 = arith.mulf %163, %162 : vector<16x512xf32>
    %165 = math.tanh %164 : vector<16x512xf32>
    %cst_66 = arith.constant 1.000000e+00 : f32
    %166 = vector.broadcast %cst_66 : f32 to vector<16x512xf32>
    %167 = arith.addf %166, %165 : vector<16x512xf32>
    %cst_67 = arith.constant 5.000000e-01 : f32
    %168 = vector.broadcast %cst_67 : f32 to vector<16x512xf32>
    %169 = arith.mulf %168, %167 : vector<16x512xf32>
    %170 = arith.mulf %157, %169 : vector<16x512xf32>
    %171 = arith.truncf %170 : vector<16x512xf32> to vector<16x512xbf16>
    %c0_68 = arith.constant 0 : index
    %c0_69 = arith.constant 0 : index
    %c0_70 = arith.constant 0 : index
    %172 = vector.load %arg12[%c0_68, %c0_69, %c0_70] : memref<1x512x128xbf16, #tpu.memory_space<vmem>>, vector<1x512x128xbf16>
    %173 = vector.shape_cast %172 : vector<1x512x128xbf16> to vector<512x128xbf16>
    %cst_71 = arith.constant dense<0.000000e+00> : vector<16x128xf32>
    %174 = tpu.matmul %171, %173, %cst_71 {dimension_numbers = #tpu.dot_dimension_numbers<[1], [0], [0], [1], [0, 0, 1, 1], [], []>} : vector<16x512xbf16>, vector<512x128xbf16>, vector<16x128xf32> -> vector<16x128xf32>
    %c0_72 = arith.constant 0 : index
    %c0_73 = arith.constant 0 : index
    %c0_74 = arith.constant 0 : index
    %175 = vector.load %arg13[%c0_72, %c0_73, %c0_74] : memref<1x1x128xf32, #tpu.memory_space<vmem>>, vector<1x1x128xf32>
    %176 = vector.shape_cast %175 : vector<1x1x128xf32> to vector<1x128xf32>
    %177 = vector.broadcast %176 : vector<1x128xf32> to vector<16x128xf32>
    %178 = arith.addf %174, %177 : vector<16x128xf32>
    %179 = arith.addf %149, %178 : vector<16x128xf32>
    %c0_75 = arith.constant 0 : index
    %c0_76 = arith.constant 0 : index
    %c0_77 = arith.constant 0 : index
    %180 = vector.load %arg14[%c0_75, %c0_76, %c0_77] : memref<1x1x128xf32, #tpu.memory_space<vmem>>, vector<1x1x128xf32>
    %181 = vector.shape_cast %180 : vector<1x1x128xf32> to vector<1x128xf32>
    %c0_78 = arith.constant 0 : index
    %c0_79 = arith.constant 0 : index
    %c0_80 = arith.constant 0 : index
    %182 = vector.load %arg15[%c0_78, %c0_79, %c0_80] : memref<1x1x128xf32, #tpu.memory_space<vmem>>, vector<1x1x128xf32>
    %183 = vector.shape_cast %182 : vector<1x1x128xf32> to vector<1x128xf32>
    %cst_81 = arith.constant dense<0.000000e+00> : vector<16xf32>
    %184 = vector.multi_reduction <add>, %179, %cst_81 [1] : vector<16x128xf32> to vector<16xf32>
    %185 = vector.shape_cast %184 : vector<16xf32> to vector<16x1xf32>
    %cst_82 = arith.constant 1.280000e+02 : f32
    %186 = vector.broadcast %cst_82 : f32 to vector<16x1xf32>
    %187 = arith.divf %185, %186 : vector<16x1xf32>
    %188 = vector.broadcast %187 : vector<16x1xf32> to vector<16x128xf32>
    %189 = arith.subf %179, %188 : vector<16x128xf32>
    %190 = arith.mulf %189, %189 : vector<16x128xf32>
    %cst_83 = arith.constant dense<0.000000e+00> : vector<16xf32>
    %191 = vector.multi_reduction <add>, %190, %cst_83 [1] : vector<16x128xf32> to vector<16xf32>
    %192 = vector.shape_cast %191 : vector<16xf32> to vector<16x1xf32>
    %cst_84 = arith.constant 1.280000e+02 : f32
    %193 = vector.broadcast %cst_84 : f32 to vector<16x1xf32>
    %194 = arith.divf %192, %193 : vector<16x1xf32>
    %195 = vector.broadcast %187 : vector<16x1xf32> to vector<16x128xf32>
    %196 = arith.subf %179, %195 : vector<16x128xf32>
    %cst_85 = arith.constant 9.99999996E-13 : f32
    %197 = vector.broadcast %cst_85 : f32 to vector<16x1xf32>
    %198 = arith.addf %194, %197 : vector<16x1xf32>
    %199 = math.rsqrt %198 : vector<16x1xf32>
    %200 = vector.broadcast %199 : vector<16x1xf32> to vector<16x128xf32>
    %201 = arith.mulf %196, %200 : vector<16x128xf32>
    %202 = vector.broadcast %181 : vector<1x128xf32> to vector<16x128xf32>
    %203 = arith.mulf %201, %202 : vector<16x128xf32>
    %204 = vector.broadcast %183 : vector<1x128xf32> to vector<16x128xf32>
    %205 = arith.addf %203, %204 : vector<16x128xf32>
    %c0_86 = arith.constant 0 : index
    %c0_87 = arith.constant 0 : index
    %206 = vector.load %arg20[%c0_86, %c0_87] : memref<16x128xf32, #tpu.memory_space<vmem>>, vector<16x128xf32>
    tpu.vector_store %arg20[%c0_86, %c0_87], %205 {strides = array<i32>} : memref<16x128xf32, #tpu.memory_space<vmem>>, vector<16x128xf32>,
    %c1_i32 = arith.constant 1 : i32
    %207 = arith.cmpi eq, %arg0, %c1_i32 : i32
    %208 = arith.extui %207 : i1 to i32
    %c0_i32_88 = arith.constant 0 : i32
    %209 = arith.cmpi ne, %208, %c0_i32_88 : i32
    scf.if %209 {
      %c0_89 = arith.constant 0 : index
      %c0_90 = arith.constant 0 : index
      %210 = tpu.strided_load %arg20[%c0_89, %c0_90] {strides = array<i32: 8, 1>} : memref<16x128xf32, #tpu.memory_space<vmem>>, vector<2x128xf32>
      %c0_91 = arith.constant 0 : index
      %c0_92 = arith.constant 0 : index
      %211 = vector.load %arg16[%c0_91, %c0_92] : memref<1x128xf32, #tpu.memory_space<vmem>>, vector<1x128xf32>
      %212 = vector.broadcast %211 : vector<1x128xf32> to vector<2x128xf32>
      %213 = arith.mulf %210, %212 : vector<2x128xf32>
      %cst_93 = arith.constant dense<0.000000e+00> : vector<2xf32>
      %214 = vector.multi_reduction <add>, %213, %cst_93 [1] : vector<2x128xf32> to vector<2xf32>
      %215 = vector.shape_cast %214 : vector<2xf32> to vector<2x1xf32>
      %c0_94 = arith.constant 0 : index
      %c0_95 = arith.constant 0 : index
      %216 = vector.load %arg17[%c0_94, %c0_95] : memref<1x1xf32, #tpu.memory_space<vmem>>, vector<1x1xf32>
      %217 = vector.broadcast %216 : vector<1x1xf32> to vector<2x1xf32>
      %218 = arith.addf %215, %217 : vector<2x1xf32>
      %c0_96 = arith.constant 0 : index
      %c0_97 = arith.constant 0 : index
      %219 = vector.load %arg18[%c0_96, %c0_97] : memref<2x1xf32, #tpu.memory_space<vmem>>, vector<2x1xf32>
      tpu.vector_store %arg18[%c0_96, %c0_97], %218 {strides = array<i32>} : memref<2x1xf32, #tpu.memory_space<vmem>>, vector<2x1xf32>,
      %c0_98 = arith.constant 0 : index
      %c0_99 = arith.constant 0 : index
      %220 = vector.load %arg3[%c0_98, %c0_99] : memref<2x1xf32, #tpu.memory_space<vmem>>, vector<2x1xf32>
      %221 = arith.subf %218, %220 : vector<2x1xf32>
      %222 = arith.mulf %221, %221 : vector<2x1xf32>
      %cst_100 = arith.constant dense<0.000000e+00> : vector<1xf32>
      %223 = vector.multi_reduction <add>, %222, %cst_100 [0] : vector<2x1xf32> to vector<1xf32>
      %224 = vector.shape_cast %223 : vector<1xf32> to vector<1x1xf32>
      %cst_101 = arith.constant 5.000000e-01 : f32
      %225 = vector.broadcast %cst_101 : f32 to vector<1x1xf32>
      %226 = arith.mulf %224, %225 : vector<1x1xf32>
      %c0_102 = arith.constant 0 : index
      %c0_103 = arith.constant 0 : index
      %227 = vector.load %arg19[%c0_102, %c0_103] : memref<1x1xf32, #tpu.memory_space<vmem>>, vector<1x1xf32>
      tpu.vector_store %arg19[%c0_102, %c0_103], %226 {strides = array<i32>} : memref<1x1xf32, #tpu.memory_space<vmem>>, vector<1x1xf32>,
    } else {
    }
    return
  }
  func.func @transform_1(%arg0: i32) -> (i32, i32) {
    %c0_i32 = arith.constant 0 : i32
    %c0_i32_0 = arith.constant 0 : i32
    %c0_i32_1 = arith.constant 0 : i32
    return %c0_i32, %c0_i32_0 : i32, i32
  }
  func.func @transform_2(%arg0: i32) -> (i32, i32) {
    %c0_i32 = arith.constant 0 : i32
    %c0_i32_0 = arith.constant 0 : i32
    %c0_i32_1 = arith.constant 0 : i32
    return %c0_i32, %c0_i32_0 : i32, i32
  }
  func.func @transform_3(%arg0: i32) -> (i32, i32, i32) {
    %c0_i32 = arith.constant 0 : i32
    %c0_i32_0 = arith.constant 0 : i32
    %c0_i32_1 = arith.constant 0 : i32
    return %arg0, %c0_i32, %c0_i32_0 : i32, i32, i32
  }
  func.func @transform_4(%arg0: i32) -> (i32, i32, i32) {
    %c0_i32 = arith.constant 0 : i32
    %c0_i32_0 = arith.constant 0 : i32
    %c0_i32_1 = arith.constant 0 : i32
    return %arg0, %c0_i32, %c0_i32_0 : i32, i32, i32
  }
  func.func @transform_5(%arg0: i32) -> (i32, i32, i32) {
    %c0_i32 = arith.constant 0 : i32
    %c0_i32_0 = arith.constant 0 : i32
    %c0_i32_1 = arith.constant 0 : i32
    return %arg0, %c0_i32, %c0_i32_0 : i32, i32, i32
  }
  func.func @transform_6(%arg0: i32) -> (i32, i32, i32) {
    %c0_i32 = arith.constant 0 : i32
    %c0_i32_0 = arith.constant 0 : i32
    %c0_i32_1 = arith.constant 0 : i32
    return %arg0, %c0_i32, %c0_i32_0 : i32, i32, i32
  }
  func.func @transform_7(%arg0: i32) -> (i32, i32, i32) {
    %c0_i32 = arith.constant 0 : i32
    %c0_i32_0 = arith.constant 0 : i32
    %c0_i32_1 = arith.constant 0 : i32
    return %arg0, %c0_i32, %c0_i32_0 : i32, i32, i32
  }
  func.func @transform_8(%arg0: i32) -> (i32, i32, i32) {
    %c0_i32 = arith.constant 0 : i32
    %c0_i32_0 = arith.constant 0 : i32
    %c0_i32_1 = arith.constant 0 : i32
    return %arg0, %c0_i32, %c0_i32_0 : i32, i32, i32
  }
  func.func @transform_9(%arg0: i32) -> (i32, i32, i32) {
    %c0_i32 = arith.constant 0 : i32
    %c0_i32_0 = arith.constant 0 : i32
    %c0_i32_1 = arith.constant 0 : i32
    return %arg0, %c0_i32, %c0_i32_0 : i32, i32, i32
  }
  func.func @transform_10(%arg0: i32) -> (i32, i32, i32) {
    %c0_i32 = arith.constant 0 : i32
    %c0_i32_0 = arith.constant 0 : i32
    %c0_i32_1 = arith.constant 0 : i32
    return %arg0, %c0_i32, %c0_i32_0 : i32, i32, i32
  }
  func.func @transform_11(%arg0: i32) -> (i32, i32, i32) {
    %c0_i32 = arith.constant 0 : i32
    %c0_i32_0 = arith.constant 0 : i32
    %c0_i32_1 = arith.constant 0 : i32
    return %arg0, %c0_i32, %c0_i32_0 : i32, i32, i32
  }
  func.func @transform_12(%arg0: i32) -> (i32, i32, i32) {
    %c0_i32 = arith.constant 0 : i32
    %c0_i32_0 = arith.constant 0 : i32
    %c0_i32_1 = arith.constant 0 : i32
    return %arg0, %c0_i32, %c0_i32_0 : i32, i32, i32
  }
  func.func @transform_13(%arg0: i32) -> (i32, i32, i32) {
    %c0_i32 = arith.constant 0 : i32
    %c0_i32_0 = arith.constant 0 : i32
    %c0_i32_1 = arith.constant 0 : i32
    return %arg0, %c0_i32, %c0_i32_0 : i32, i32, i32
  }
  func.func @transform_14(%arg0: i32) -> (i32, i32, i32) {
    %c0_i32 = arith.constant 0 : i32
    %c0_i32_0 = arith.constant 0 : i32
    %c0_i32_1 = arith.constant 0 : i32
    return %arg0, %c0_i32, %c0_i32_0 : i32, i32, i32
  }
  func.func @transform_15(%arg0: i32) -> (i32, i32) {
    %c0_i32 = arith.constant 0 : i32
    %c0_i32_0 = arith.constant 0 : i32
    %c0_i32_1 = arith.constant 0 : i32
    return %c0_i32, %c0_i32_0 : i32, i32
  }
  func.func @transform_16(%arg0: i32) -> (i32, i32) {
    %c0_i32 = arith.constant 0 : i32
    %c0_i32_0 = arith.constant 0 : i32
    %c0_i32_1 = arith.constant 0 : i32
    return %c0_i32, %c0_i32_0 : i32, i32
  }
  func.func @transform_17(%arg0: i32) -> (i32, i32) {
    %c0_i32 = arith.constant 0 : i32
    %c0_i32_0 = arith.constant 0 : i32
    %c0_i32_1 = arith.constant 0 : i32
    return %c0_i32, %c0_i32_0 : i32, i32
  }
  func.func @transform_18(%arg0: i32) -> (i32, i32) {
    %c0_i32 = arith.constant 0 : i32
    %c0_i32_0 = arith.constant 0 : i32
    %c0_i32_1 = arith.constant 0 : i32
    return %c0_i32, %c0_i32_0 : i32, i32
  }
}

</mosaic_0001>

<bundles_post_ra>
// kernel: forward.1
= control target key start
LH: loop header
LB: loop body
LE: loop exit
PB: predicated region body
PF: predicated region fallthrough
CT: control target
= control target key end

     0   :  { %s4176_s0 = inlined_call_operand.vmem [shape: f32[16,128], index: 0, kind: input, shape index: {}]   ;;  %s4177_s1 = inlined_call_operand.vmem [shape: f32[2,8], index: 1, kind: input, shape index: {}]   ;;  %s4178_s2 = inlined_call_operand.vmem [shape: f32[2,1], index: 2, kind: input, shape index: {}]   ;;  %s4179_s3 = inlined_call_operand.hbm [shape: bf16[2,128,384], index: 3, kind: input, shape index: {}]   ;;  %s4180_s4 = inlined_call_operand.vmem [shape: f32[2,1,384], index: 4, kind: input, shape index: {}]   ;;  %s4181_s5 = inlined_call_operand.vmem [shape: bf16[2,128,128], index: 5, kind: input, shape index: {}]   ;;  %s4182_s6 = inlined_call_operand.vmem [shape: f32[2,1,128], index: 6, kind: input, shape index: {}]   ;;  %s4183_s7 = inlined_call_operand.vmem [shape: f32[2,1,128], index: 7, kind: input, shape index: {}]   ;;  %s4184_s8 = inlined_call_operand.vmem [shape: f32[2,1,128], index: 8, kind: input, shape index: {}]   ;;  %s4185_s9 = inlined_call_operand.hbm [shape: bf16[2,128,512], index: 9, kind: input, shape index: {}]   ;;  %s4186_s10 = inlined_call_operand.vmem [shape: f32[2,1,512], index: 10, kind: input, shape index: {}]   ;;  %s4187_s11 = inlined_call_operand.hbm [shape: bf16[2,512,128], index: 11, kind: input, shape index: {}]   ;;  %s4188_s12 = inlined_call_operand.vmem [shape: f32[2,1,128], index: 12, kind: input, shape index: {}]   ;;  %s4189_s13 = inlined_call_operand.vmem [shape: f32[2,1,128], index: 13, kind: input, shape index: {}]   ;;  %s4190_s14 = inlined_call_operand.vmem [shape: f32[2,1,128], index: 14, kind: input, shape index: {}]   ;;  %s4191_s15 = inlined_call_operand.vmem [shape: f32[1,128], index: 15, kind: input, shape index: {}]   ;;  %s4192_s16 = inlined_call_operand.<no memory space> [shape: f32[1,1], index: 16, kind: input, shape index: {}]   ;;  %s4193_s17 = inlined_call_operand.vmem [shape: f32[2,1], index: 17, kind: output, shape index: {0}]   ;;  %s4194_s18 = inlined_call_operand.hbm [shape: f32[1,1], index: 18, kind: output, shape index: {1}]  }
   0x1   :  { %4200 = sst [smem:[#allocation21_spill]] %s4176_s0  ;;  %v24_v0 = vstv %s4192_s16 }
   0x2   :  { %4201 = sst [smem:[#allocation22_spill]] %s4177_s1  ;;  %25 = vst [vmem:[#allocation4] sm:$0x1] %v24_v0 }
   0x3   :  { %4202 = sst [smem:[#allocation23_spill]] %s4178_s2 }
   0x4   :  { %4203 = sst [smem:[#allocation24_spill]] %s4179_s3 }
   0x5   :  { %4204 = sst [smem:[#allocation25_spill]] %s4180_s4 }
   0x6   :  { %4205 = sst [smem:[#allocation26_spill]] %s4181_s5 }
   0x7   :  { %4206 = sst [smem:[#allocation27_spill]] %s4185_s9 }
   0x8   :  { %4207 = sst [smem:[#allocation28_spill]] %s4187_s11 }
   0x9   :  { %4208 = sst [smem:[#allocation29_spill]] %s4188_s12 }
   0xa   :  { %4209 = sst [smem:[#allocation30_spill]] %s4189_s13 }
   0xb   :  { %4210 = sst [smem:[#allocation31_spill]] %s4190_s14 }
   0xc   :  { %4211 = sst [smem:[#allocation32_spill]] %s4191_s15 }
   0xd   :  { %4212 = sst [smem:[#allocation33_spill]] %s4193_s17 }
   0xe   :  { %4213 = sst [smem:[#allocation34_spill]] %s4194_s18 }
   0xf   :  { %26 = vsyncpa [#allocation6], 0 }
  0x10   :  { %28 = vsyncpa [#allocation6 + $0x1], 0 }
  0x11   :  { %29 = vsyncpa [#allocation9], 0 }
  0x12   :  { %31 = vsyncpa [#allocation9 + $0x1], 0 }
  0x13   :  { %32 = vsyncpa [#allocation7], 0  ;;  %s3580_s29 = smov 0   ;;  %s3582_s30 = smov 0  }
  0x14   :  { %s3584_s0 = smov 0   ;;  %s3586_s19 = smov 0  }
  0x15 LB: > { %4214 = sst [smem:[#allocation18_spill]] %s3465_s0  ;;  %s3599_s16 = sadd.s32 4294967295, %s3469_s19   ;;  %s3469_s19 = sphi %s3586_s19, %s4240_s19   ;;  %s3465_s0 = sphi %s3584_s0, %s4242_s0   ;;  %s3461_s30 = sphi %s3582_s30, %s4244_s30   ;;  %s3457_s29 = sphi %s3580_s29, %s4243_s29  }
  0x16   : > { %s3602_s1 = sadd.s32 1, %s3469_s19   ;;  %s87_s21 = sadd.s32 1, %s3465_s0 }
  0x17   : > { %4215 = sst [smem:[#allocation19_spill]] %s3602_s1  ;;  %s84_s20 = ssub.s32 %s3469_s19, %s3602_s1 }
  0x18   : > { %p85_p0 = scmp.eq.s32.totalorder %s84_s20, 0  ;;  %p94_p1 = scmp.ne.s32.totalorder %s3465_s0, %s3461_s30 }
  0x19   : > { %p95_p2 = scmp.eq.s32.totalorder %s3469_s19, 0  ;;  %p100_p3 = scmp.ne.s32.totalorder %s3461_s30, %s3457_s29 }
  0x1a   : > { %s3612_s22 = scalar_select %p85_p0, %s3465_s0, %s87_s21  }
  0x1b   : > { %p96_p4 = por %p95_p2, %p94_p1  ;;  %p101_p5 = scmp.eq.s32.totalorder %s3599_s16, 0 }
  0x1c   : > { %4216 = sst [smem:[#allocation20_spill]] %s3612_s22  ;;  %p3195_p6 = scmp.lt.s32.totalorder %s3469_s19, 2 }
  0x1d   : > { %p3616_p7 = por %p101_p5, %p100_p3  ;;  %s3621_s23 = sand.u32 1, %s3465_s0  }
  0x1e   : > { %p3623_p8 = pnand %p3195_p6, %p96_p4  ;;  %s561_s25 = sand.u32 1, %s3469_s19  }
  0x1f   : > { %s4199_s26 = sshll.u32 %s3621_s23, 8  ;;  %s3071_s27 = sshll.u32 %s3469_s19, 8 }
  0x20   : > { %s565_s28 = scalar_lea.vmem [#allocation8], %s4199_s26  ;;  %s4219_s9 = sld [smem:[#allocation27_spill]] }
  0x21   : > { %s573_s29 = sshll.u32 %s565_s28, 4  ;;  %s3635_s1 = scalar_lea.sflag [#allocation9], %s561_s25  ;;  %s574_s29 = int_to_ptr.vmem [resolvable:$true] %s573_s29 }
  0x22   : > { %p3311_p10 = pneg %p3623_p8 }
  0x26   : > { %s570_s22 = scalar_lea.hbm %s4219_s9, %s3071_s27  ;;  %s3314_s20 = scalar_lea.hbm %s4219_s9, 512 }
  0x27   : > { %s571_s0 = sshll.u32 %s570_s22, 4  ;;  %s572_s0 = int_to_ptr.hbm [resolvable:$true] %s571_s0 }
  0x28   : > { %s3307_s18 = sshra.s32 %s572_s0, 4  ;;  %s3308_s18 = int_to_ptr.hbm [resolvable:$true] %s3307_s18 }
  0x29   : > { %s3309_s17 = scalar_lea.hbm %s3308_s18, 256  ;;  %p3315_p13 = scmp.lt.s32.totalorder %s3308_s18, %s4219_s9 }
  0x2a   : > { %p3310_p9 = scmp.ne.s32.totalorder %s3308_s18, %s3309_s17  ;;  %p3316_p0 = scmp.lt.s32.totalorder %s3314_s20, %s3309_s17 }
  0x2c   : > { %p3312_p11 = pnand %p3311_p10, %p3310_p9  ;;  %p3317_p1 = por %p3316_p0, %p3315_p13 }
  0x2e   : > { %p3313_p12 = pneg %p3312_p11 }
  0x30   : > { %p3318_p2 = pnand %p3317_p1, %p3313_p12 }
  0x32   : > { %3321 = shalt.err (!%p3318_p2)
}
  0x33   : > { %s3471_s22 = smov 256   ;;  %s3472_s25 = smov 16  }
  0x34   : > { %3191 = dma.hbm_to_vmem [thread:$0]  (!%p3623_p8), %s572_s0, 4096, %s574_s29, %s3635_s1, %s3471_s22, %s3471_s22, %s3472_s25  }
  0x35   : > { %s4220_s11 = sld [smem:[#allocation28_spill]]  ;;  %s4221_s17 = sshll.u32 %s3621_s23, 8 }
  0x36   : > { %s594_s20 = scalar_lea.vmem [#allocation10], %s4221_s17  ;;  %p2654_p3 = scmp.ge.s32.totalorder %s3469_s19, 1 }
  0x37   : > { %s602_s21 = sshll.u32 %s594_s20, 4  ;;  %p628_p4 = scmp.lt.s32.totalorder %s3469_s19, 3  ;;  %s3658_s21 = int_to_ptr.vmem [resolvable:$true] %s602_s21 }
  0x38   : > { %s3171_s9 = smul.u32 192, %s3621_s23  ;;  %s4223_s3 = sld [smem:[#allocation24_spill]] }
  0x39   : > { %p3663_p5 = pnand %p2654_p3, %p628_p4  ;;  %s3172_s0 = smul.u32 192, %s3469_s19 }
  0x3a   : > { %s510_s25 = scalar_lea.vmem [#allocation5], %s3171_s9 }
  0x3b   : > { %s599_s15 = scalar_lea.hbm %s4220_s11, %s3071_s27  ;;  %s518_s26 = sshll.u32 %s510_s25, 4  ;;  %s519_s26 = int_to_ptr.vmem [resolvable:$true] %s518_s26 }
  0x3c   : > { %s600_s18 = sshll.u32 %s599_s15, 4  ;;  %s507_s15 = scalar_lea.sflag [#allocation6], %s3621_s23  ;;  %s3656_s18 = int_to_ptr.hbm [resolvable:$true] %s600_s18 }
  0x3e   : > { %s515_s22 = scalar_lea.hbm %s4223_s3, %s3172_s0  ;;  %s3344_s12 = scalar_lea.hbm %s4223_s3, 384 }
  0x3f   : > { %s516_s28 = sshll.u32 %s515_s22, 4  ;;  %s517_s28 = int_to_ptr.hbm [resolvable:$true] %s516_s28 }
  0x40   : > { %s3337_s17 = sshra.s32 %s517_s28, 4  ;;  %s3338_s17 = int_to_ptr.hbm [resolvable:$true] %s3337_s17 }
  0x41   : > { %s3339_s20 = scalar_lea.hbm %s3338_s17, 192  ;;  %p3345_p12 = scmp.lt.s32.totalorder %s3338_s17, %s4223_s3 }
  0x42   : > { %p3340_p6 = scmp.ne.s32.totalorder %s3338_s17, %s3339_s20  ;;  %p3346_p13 = scmp.lt.s32.totalorder %s3344_s12, %s3339_s20 }
  0x44   : > { %p3342_p9 = pnand %p3340_p6, %p3311_p10  ;;  %p3347_p0 = por %p3346_p13, %p3345_p12 }
  0x46   : > { %p3343_p11 = pneg %p3342_p9 }
  0x48   : > { %p3348_p1 = pnand %p3347_p0, %p3343_p11 }
  0x4a   : > { %3351 = shalt.err (!%p3348_p1)
}
  0x4b   : > { %s3473_s9 = smov 192   ;;  %s3474_s23 = smov 12  }
  0x4c   : > { %3188 = dma.hbm_to_vmem [thread:$0]  (!%p3623_p8), %s517_s28, 3072, %s519_s26, %s507_s15, %s3473_s9, %s3473_s9, %s3474_s23  }
  0x4d   : > { %s3367_s27 = sshra.s32 %s3656_s18, 4  ;;  %s3374_s25 = scalar_lea.hbm %s4220_s11, 512  ;;  %s3368_s27 = int_to_ptr.hbm [resolvable:$true] %s3367_s27 }
  0x4e   : > { %s3369_s22 = scalar_lea.hbm %s3368_s27, 256  ;;  %p3375_p6 = scmp.lt.s32.totalorder %s3368_s27, %s4220_s11 }
  0x4f   : > { %p3370_p2 = scmp.ne.s32.totalorder %s3368_s27, %s3369_s22  ;;  %p3376_p9 = scmp.lt.s32.totalorder %s3374_s25, %s3369_s22 }
  0x51   : > { %p3372_p3 = pnand %p3370_p2, %p3311_p10  ;;  %p3377_p11 = por %p3376_p9, %p3375_p6 }
  0x53   : > { %p3373_p4 = pneg %p3372_p3 }
  0x55   : > { %p3378_p12 = pnand %p3377_p11, %p3373_p4 }
  0x57   : > { %3381 = shalt.err (!%p3378_p12)
}
  0x58   : > { %s3475_s26 = smov 64   ;;  %s3476_s28 = smov 4  }
  0x59   : > { %3194 = dma.hbm_to_vmem [thread:$0]  (!%p3623_p8), %s3656_s18, 4096, %s3658_s21, %s3635_s1, %s3475_s26, %s3475_s26, %s3476_s28  }
  0x5a   : > { %632 = sbr.rel (%p3663_p5) target bundleno = 2272 (0x8e0), region = 84  ;;  %s634_s15 = sand.u32 (!%p3663_p5), 1, %s3461_s30  }
  0x5b   : > { %s3173_s19 = smul.u32 (!%p3663_p5), 192, %s634_s15  ;;  %s635_s29 = scalar_lea.sflag (!%p3663_p5), [#allocation6], %s634_s15 }
  0x5d   : > { %s3701_s0 = scalar_lea.vmem (!%p3663_p5), [#allocation5], %s3173_s19 }
  0x5f   : > { %3442 = dma.done.wait (%p3616_p7), %s635_s29, 3072  }
  0x60   : > { %3444 = vsyncadd (%p3616_p7), %s635_s29, 4294964224  ;;  %s644_s9 = sand.u32 1, %s3599_s16   ;;  %s2655_s24 = sshll.u32 %s634_s15, 8 }
  0x61   : > { %s645_s1 = scalar_lea.sflag [#allocation9], %s644_s9  ;;  %s3708_s18 = scalar_lea.vmem [#allocation8], %s2655_s24 }
  0x62   : > { %3446 = dma.done.wait (%p3616_p7), %s645_s1, 8192  }
  0x63   : > { %3448 = vsyncadd (%p3616_p7), %s645_s1, 4294959104  ;;  %p746_p8 = scmp.lt.s32.totalorder %s3599_s16, 1  ;;  %s4224_s5 = sld [smem:[#allocation26_spill]] }
  0x64   : > { %s4225_s4 = sld [smem:[#allocation25_spill]]  ;;  %s3760_s29 = scalar_lea.vmem [#allocation10], %s2655_s24 }
  0x65   : > { %s3716_s14 = scalar_select %p746_p8, %s3599_s16, 1 }
  0x66   : > { %s4226_s25 = sld [smem:[#allocation29_spill]]  ;;  %p2660_p7 = scmp.ne.s32.totalorder %s3599_s16, 0 }
  0x67   : > { %s3174_s21 = smul.u32 3, %s3716_s14  ;;  %s3073_s23 = sshll.u32 %s3716_s14, 6 }
  0x68   : > { %s763_s1 = scalar_lea.vmem %s4184_s8, %s3716_s14  ;;  %s2659_s27 = sshll.u32 %s3716_s14, 2 }
  0x69   : > { %s3723_s2 = scalar_lea.vmem %s4224_s5, %s3073_s23  ;;  %s3746_s3 = scalar_lea.vmem %s4186_s10, %s2659_s27 }
  0x6a   : > { %s3732_s26 = scalar_lea.vmem %s4225_s4, %s3174_s21  ;;  %s4227_s4 = sld [smem:[#allocation30_spill]] }
  0x6b   : > { %s4228_s19 = sld [smem:[#allocation31_spill]] }
  0x6c   : > { %s770_s17 = scalar_lea.vmem %s4226_s25, %s3716_s14 }
  0x6d   : > { %781 = sbr.rel (%p2660_p7) target bundleno = 126 (0x7e), region = 100 }
  0x70   : > { %s773_s5 = scalar_lea.vmem %s4227_s4, %s3716_s14 }
  0x71   : > { %s776_s11 = scalar_lea.vmem %s4228_s19, %s3716_s14 }
  0x72   : > { %s4229_s23 = sld [smem:[#allocation21_spill]] }
  0x78   : > { %v792_v1 = vld [vmem:[%s4229_s23] sm:$0xff]  ;;  %v794_v2 = vld [vmem:[%s4229_s23 + $0x8] sm:$0xff] }
  0x79   : > { %793 = vst [vmem:[#allocation2] sm:$0xff] %v792_v1 }
  0x7a   : > { %795 = vst [vmem:[#allocation2 + $0x8] sm:$0xff] %v794_v2 }
  0x7b   : > { %801 = vsyncadd [#allocation12], 256 }
  0x7c   : > { %3449 = dma.done.wait [#allocation12], 256 }
  0x7d   : > { %3450 = vsyncadd [#allocation12], 4294967040 }
  0x7e PF: > { %v2748_v3 = vld [vmem:[%s3701_s0 + $0xa8] sm:$0xf]  ;;  %v3096_v4 = vld [vmem:[%s3701_s0 + $0xb0] sm:$0xf0]  ;;  %v3095_v5 = vld [vmem:[%s3701_s0 + $0xac] sm:$0xf]  ;;  %s4231_s20 = scalar_lea.vmem %s4182_s6, %s3716_s14  ;;  %s4232_s28 = scalar_lea.vmem %s4183_s7, %s3716_s14 }
  0x7f   : > { %v2749_v6 = vor.u32 %v3096_v4, %v2748_v3  ;;  %v2750_v7 = vld [vmem:[%s3701_s0 + $0xb4] sm:$0xf0]  ;;  %v2736_v8 = vld [vmem:[%s3701_s0 + $0x90] sm:$0xf]  ;;  %v3093_v9 = vld [vmem:[%s3701_s0 + $0x98] sm:$0xf0] }
  0x80   : > { %v2753_v10 = vor.u32 %v3095_v5, %v2750_v7  ;;  %v3092_v11 = vld [vmem:[%s3701_s0 + $0x94] sm:$0xf]  ;;  %v2738_v12 = vld [vmem:[%s3701_s0 + $0x9c] sm:$0xf0]  ;;  %v2737_v13 = vor.u32 %v3093_v9, %v2736_v8  ;;  %v2724_v15 = vld [vmem:[%s3701_s0 + $0x78] sm:$0xf] }
  0x81   : > { %979 = vmatpush.bf16.msra.mxu0 %v2749_v6  ;;  %v2741_v14 = vor.u32 %v3092_v11, %v2738_v12  ;;  %v3090_v16 = vld [vmem:[%s3701_s0 + $0x80] sm:$0xf0]  ;;  %v3089_v17 = vld [vmem:[%s3701_s0 + $0x7c] sm:$0xf]  ;;  %v2726_v18 = vld [vmem:[%s3701_s0 + $0x84] sm:$0xf0] }
  0x82   : > { %993 = vmatpush.bf16.msra.mxu1 %v2753_v10  ;;  %v2725_v19 = vor.u32 %v3090_v16, %v2724_v15  ;;  %v2729_v20 = vor.u32 %v3089_v17, %v2726_v18  ;;  %v2712_v21 = vld [vmem:[%s3701_s0 + $0x60] sm:$0xf]  ;;  %v3087_v22 = vld [vmem:[%s3701_s0 + $0x68] sm:$0xf0]  ;;  %v3086_v23 = vld [vmem:[%s3701_s0 + $0x64] sm:$0xf] }
  0x83   : > { %v2714_v24 = vld [vmem:[%s3701_s0 + $0x6c] sm:$0xf0]  ;;  %v2700_v25 = vld [vmem:[%s3701_s0 + $0x48] sm:$0xf]  ;;  %v2713_v26 = vor.u32 %v3087_v22, %v2712_v21  ;;  %v3084_v27 = vld [vmem:[%s3701_s0 + $0x50] sm:$0xf0] }
  0x84   : > { %v3083_v28 = vld [vmem:[%s3701_s0 + $0x4c] sm:$0xf]  ;;  %v2717_v29 = vor.u32 %v3086_v23, %v2714_v24  ;;  %v2702_v30 = vld [vmem:[%s3701_s0 + $0x54] sm:$0xf0]  ;;  %v2701_v31 = vor.u32 %v3084_v27, %v2700_v25  ;;  %v2688_v33 = vld [vmem:[%s3701_s0 + $0x30] sm:$0xf] }
  0x85   : > { %980 = vmatpush.bf16.msra.mxu0 %v2737_v13  ;;  %v2705_v32 = vor.u32 %v3083_v28, %v2702_v30  ;;  %v3081_v34 = vld [vmem:[%s3701_s0 + $0x38] sm:$0xf0]  ;;  %v3080_v35 = vld [vmem:[%s3701_s0 + $0x34] sm:$0xf]  ;;  %v2690_v36 = vld [vmem:[%s3701_s0 + $0x3c] sm:$0xf0] }
  0x86   : > { %994 = vmatpush.bf16.msra.mxu1 %v2741_v14  ;;  %v2689_v37 = vor.u32 %v3081_v34, %v2688_v33  ;;  %v2693_v38 = vor.u32 %v3080_v35, %v2690_v36  ;;  %v2676_v39 = vld [vmem:[%s3701_s0 + $0x18] sm:$0xf]  ;;  %v3078_v40 = vld [vmem:[%s3701_s0 + $0x20] sm:$0xf0]  ;;  %v3077_v41 = vld [vmem:[%s3701_s0 + $0x1c] sm:$0xf] }
  0x87   : > { %v2678_v42 = vld [vmem:[%s3701_s0 + $0x24] sm:$0xf0]  ;;  %v2677_v43 = vor.u32 %v3078_v40, %v2676_v39  ;;  %v2664_v45 = vld [vmem:[%s3701_s0] sm:$0xf]  ;;  %v3075_v46 = vld [vmem:[%s3701_s0 + $0x8] sm:$0xf0] }
  0x88   : > { %v2681_v44 = vor.u32 %v3077_v41, %v2678_v42  ;;  %v3074_v47 = vld [vmem:[%s3701_s0 + $0x4] sm:$0xf]  ;;  %v2666_v48 = vld [vmem:[%s3701_s0 + $0xc] sm:$0xf0]  ;;  %v2665_v49 = vor.u32 %v3075_v46, %v2664_v45  ;;  %vm1027_vm0 = vcmask 261120   ;;  %s3477_s4 = smov 64  }
  0x89   : > { %981 = vmatpush.bf16.msra.mxu0 %v2725_v19  ;;  %v3801_v50 = vld [vmem:[#allocation2] sm:$0xff]  ;;  %v3803_v51 = vld [vmem:[#allocation2 + $0x8] sm:$0xff]  ;;  %v2669_v52 = vor.u32 %v3074_v47, %v2666_v48  ;;  %s3478_s24 = smov 96   ;;  %v3097_v0 = vld [vmem:[%s3701_s0 + $0xb8] sm:$0xf0]  ;;  %s3479_s25 = smov 32  }
  0x8a   : > { %995 = vmatpush.bf16.msra.mxu1 %v2729_v20  ;;  %v3807_v53 = vpack.c.bf16 %v3803_v51, %v3801_v50  ;;  %v3812_v54 = vld [vmem:[%s3732_s26] sm:$0x7]  ;;  %v2756_v63 = vld [vmem:[%s3701_s0 + $0xb0] sm:$0xf]  ;;  %v2744_v2 = vld [vmem:[%s3701_s0 + $0x98] sm:$0xf] }
  0x8b   : > { %v845_v55 = vperm.slane %v3812_v54, 0  ;;  %v846_v56 = vperm.slane %v3812_v54, 1  ;;  %v2757_v1 = vor.u32 %v3097_v0, %v2756_v63  ;;  %v3094_v3 = vld [vmem:[%s3701_s0 + $0xa0] sm:$0xf0]  ;;  %v2732_v11 = vld [vmem:[%s3701_s0 + $0x80] sm:$0xf] }
  0x8c   : > { %v2745_v9 = vor.u32 %v3094_v3, %v2744_v2  ;;  %v3091_v12 = vld [vmem:[%s3701_s0 + $0x88] sm:$0xf0]  ;;  %v2720_v17 = vld [vmem:[%s3701_s0 + $0x68] sm:$0xf]  ;;  %v3088_v18 = vld [vmem:[%s3701_s0 + $0x70] sm:$0xf0] }
  0x8d   : > { %982 = vmatpush.bf16.msra.mxu0 %v2713_v26  ;;  %1007 = vmatpush.bf16.msra.mxu2 %v2757_v1  ;;  %v2733_v15 = vor.u32 %v3091_v12, %v2732_v11  ;;  %v2721_v21 = vor.u32 %v3088_v18, %v2720_v17  ;;  %v2708_v22 = vld [vmem:[%s3701_s0 + $0x50] sm:$0xf]  ;;  %v3085_v23 = vld [vmem:[%s3701_s0 + $0x58] sm:$0xf0]  ;;  %v2696_v26 = vld [vmem:[%s3701_s0 + $0x38] sm:$0xf] }
  0x8e   : > { %996 = vmatpush.bf16.msra.mxu1 %v2717_v29  ;;  %v2709_v25 = vor.u32 %v3085_v23, %v2708_v22  ;;  %v3082_v27 = vld [vmem:[%s3701_s0 + $0x40] sm:$0xf0]  ;;  %v2684_v29 = vld [vmem:[%s3701_s0 + $0x20] sm:$0xf]  ;;  %v3079_v30 = vld [vmem:[%s3701_s0 + $0x28] sm:$0xf0] }
  0x8f   : > { %v2697_v28 = vor.u32 %v3082_v27, %v2696_v26  ;;  %v3076_v33 = vld [vmem:[%s3701_s0 + $0x10] sm:$0xf0]  ;;  %s4230_s19 = sld [smem:[#allocation22_spill]]  ;;  %vm1078_vm1 = vcmask 64512   ;;  %vm1106_vm2 = vcmask 1043456   ;;  %vm1144_vm3 = vcmask 257024  }
  0x90   : > { %vm1285_vm4 = vcmask 519424   ;;  %vm1416_vm5 = vcmask 781824   ;;  %vm1547_vm6 = vcmask 1044224   ;;  %p3066_p10 = scmp.ne.s32.totalorder %s3599_s16, 1 }
  0x91   : > { %983 = vmatpush.bf16.msra.mxu0 %v2701_v31  ;;  %1008 = vmatpush.bf16.msra.mxu2 %v2745_v9  ;;  %v2685_v31 = vor.u32 %v3079_v30, %v2684_v29  ;;  %s4236_s14 = sld [smem:[#allocation32_spill]] (!%p3066_p10) }
  0x92   : > { %997 = vmatpush.bf16.msra.mxu1 %v2705_v32  ;;  %v2672_v32 = vld [vmem:[%s3701_s0 + $0x8] sm:$0xf]  ;;  %s4237_s26 = sld [smem:[#allocation23_spill]] (!%p3066_p10) }
  0x93   : > { %v2673_v34 = vor.u32 %v3076_v33, %v2672_v32  ;;  %s4238_s21 = sld [smem:[#allocation33_spill]] (!%p3066_p10) }
  0x95   : > { %984 = vmatpush.bf16.msra.mxu0 %v2689_v37  ;;  %1009 = vmatpush.bf16.msra.mxu2 %v2733_v15 }
  0x96   : > { %998 = vmatpush.bf16.msra.mxu1 %v2693_v38 }
  0x99   : > { %985 = vmatpush.bf16.msra.mxu0 %v2677_v43  ;;  %1010 = vmatpush.bf16.msra.mxu2 %v2721_v21 }
  0x9a   : > { %999 = vmatpush.bf16.msra.mxu1 %v2681_v44 }
  0x9d   : > { %986 = vmatpush.bf16.msra.mxu0 %v2665_v49  ;;  %1011 = vmatpush.bf16.msra.mxu2 %v2709_v25 }
  0x9e   : > { %1000 = vmatpush.bf16.msra.mxu1 %v2669_v52 }
  0xa0   : > { %987 = vmatmul.bf16.vlgmr.msra.gmra.mxu0 %v3807_v53 }
  0xa1   : > { %1001 = vmatmul.bf16.vlgmr.msra.gmra.mxu1 %v3807_v53  ;;  %1012 = vmatpush.bf16.msra.mxu2 %v2697_v28 }
  0xa5   : > { %1013 = vmatpush.bf16.msra.mxu2 %v2685_v31 }
  0xa9   : > { %1014 = vmatpush.bf16.msra.mxu2 %v2673_v34 }
  0xac   : > { %1015 = vmatmul.bf16.vlgmr.msra.gmra.mxu2 %v3807_v53  ;;  %v807_v53 = vld [vmem:[%s4230_s19] sm:$0x3] }
 0x11d   : > { %v988_v57 = vpop.f32.mrf.mxu0 }
 0x11e   : > { %v989_v58 = vadd.f32 %v988_v57, %v845_v55  ;;  %v1002_v59 = vpop.f32.mrf.mxu1  ;;  %v2661_v57 = vadd.f32 -1.0, %v807_v53 }
 0x11f   : > { %v1003_v60 = vadd.f32 %v1002_v59, %v846_v56 }
 0x121   : > { %v1021_v61 = vpack.c.bf16 %v1003_v60, %v989_v58  ;;  %v809_v58 = vmul.f32 1e+09, %v2661_v57 }
 0x123   : > { %1288 = vrot.lane.b32.xlu2 %v1021_v61, %s3477_s4  ;;  %1147 = vrot.lane.b32.xlu0 %v1021_v61, %s3478_s24  ;;  %v1026_v62 = vrot.slane %v1021_v61, 4  ;;  %v1150_v8 = vunpack.c.l.b16 %v1021_v61 }
 0x125   : > { %v990_v4 = vpop.f32.mrf.mxu0  ;;  %v1032_v5 = vsel %vm1027_vm0, %v1026_v62, 0  ;;  %v1151_v14 = vpack.c.b16 %v1150_v8, %v1150_v8  ;;  %v3859_v62 = vperm.slane %v809_v58, 0 }
 0x126   : > { %v991_v6 = vadd.f32 %v990_v4, %v845_v55  ;;  %v1004_v7 = vpop.f32.mrf.mxu1  ;;  %1041 = vmatpush.bf16.xpose.msra.mxu3 %v1032_v5 }
 0x127   : > { %v1005_v10 = vadd.f32 %v1004_v7, %v846_v56 }
 0x129   : > { %v1023_v13 = vpack.c.bf16 %v1005_v10, %v991_v6  ;;  %v1071_v6 = vrot.slane %v809_v58, 1 }
 0x12b   : > { %1173 = vrot.lane.b32.xlu1 %v1023_v13, %s3478_s24  ;;  %1312 = vrot.lane.b32.xlu2 %v1023_v13, %s3477_s4  ;;  %v1048_v16 = vrot.slane %v1023_v13, 4  ;;  %v1176_v20 = vunpack.c.l.b16 %v1023_v13  ;;  %v3866_v7 = vperm.slane %v1071_v6, 0 }
 0x12c   : > { %1152 = vrot.lane.b32.xlu0 %v1151_v14, %s3478_s24 }
 0x12d   : > { %2758 = vmatmul.msk.bf16.vlgmr.msra.gmra.mxu3 %vm1027_vm0, %v1021_v61  ;;  %v1053_v19 = vsel %vm1027_vm0, %v1048_v16, 0  ;;  %v1177_v24 = vpack.c.b16 %v1176_v20, %v1176_v20 }
 0x12e   : > { %1062 = vmatpush.bf16.xpose.msrb.mxu3 %v1053_v19 }
 0x12f   : > { %v1016_v15 = vpop.f32.mrf.mxu2 }
 0x133   : > { %1178 = vrot.lane.b32.xlu1 %v1177_v24, %s3478_s24  ;;  %1419 = vrot.lane.b32.xlu2 %v1021_v61, %s3479_s25 }
 0x134   : > { %1291 = vrot.lane.b32.xlu0 %v1151_v14, %s3477_s4 }
 0x137   : > { %v1018_v21 = vpop.f32.mrf.mxu2 }
 0x13b   : > { %1315 = vrot.lane.b32.xlu1 %v1177_v24, %s3477_s4  ;;  %1446 = vrot.lane.b32.xlu2 %v1177_v24, %s3479_s25 }
 0x13c   : > { %1443 = vrot.lane.b32.xlu0 %v1023_v13, %s3479_s25 }
 0x13d   : > { %2759 = vmatmul.msk.bf16.vlgmr.msrb.gmra.mxu3 %vm1027_vm0, %v1023_v13 }
 0x143   : > { %1422 = vrot.lane.b32.xlu1 %v1151_v14, %s3479_s25  ;;  %v847_v14 = vperm.slane %v3812_v54, 2 }
 0x145   : > { %v1017_v16 = vadd.f32 %v1016_v15, %v847_v14  ;;  %v1019_v22 = vadd.f32 %v1018_v21, %v847_v14 }
 0x147   : > { %v1022_v17 = vpack.c.bf16 %v1017_v16, %v1017_v16  ;;  %v1024_v23 = vpack.c.bf16 %v1019_v22, %v1019_v22 }
 0x149   : > { %v1108_v18 = vsel %vm1106_vm2, %v1022_v17, 0  ;;  %v1228_v19 = vunpack.c.l.b16 %v1022_v17  ;;  %v1127_v24 = vsel %vm1106_vm2, %v1024_v23, 0 }
 0x14a   : > { %1117 = vmatpush.bf16.msra.mxu3 %v1108_v18  ;;  %1136 = vmatpush.bf16.msrb.mxu0 %v1127_v24 }
 0x14b   : > { %v3874_v20 = vpack.c.b16 %v1228_v19, %v1228_v19 }
 0x17d   : > { %v1289_v35 = vpop.permute.xlu2 %1288 }
 0x17e   : > { %v1290_v36 = vrot.slane %v1289_v35, 4 }
 0x180   : > { %v1297_v37 = vsel %vm1027_vm0, %v1290_v36, 0 }
 0x181   : > { %1306 = vmatpush.bf16.xpose.msrb.mxu1 %v1297_v37 }
 0x185   : > { %v1313_v38 = vpop.permute.xlu2 %1312 }
 0x186   : > { %v1314_v45 = vrot.slane %v1313_v38, 4 }
 0x188   : > { %v1321_v52 = vsel %vm1027_vm0, %v1314_v45, 0 }
 0x18d   : > { %v1420_v39 = vpop.permute.xlu2 %1419 }
 0x18e   : > { %v1421_v40 = vrot.slane %v1420_v39, 4 }
 0x190   : > { %v1428_v41 = vsel %vm1027_vm0, %v1421_v40, 0 }
 0x191   : > { %1437 = vmatpush.bf16.xpose.msra.mxu1 %v1428_v41 }
 0x195   : > { %v1148_v42 = vpop.permute.xlu0 %1147  ;;  %v1447_v13 = vpop.permute.xlu2 %1446 }
 0x196   : > { %v1149_v43 = vrot.slane %v1148_v42, 4 }
 0x198   : > { %v1158_v44 = vsel %vm1027_vm0, %v1149_v43, 0 }
 0x199   : > { %1167 = vmatpush.bf16.xpose.msrb.mxu2 %v1158_v44 }
 0x19d   : > { %v1174_v46 = vpop.permute.xlu1 %1173 }
 0x19e   : > { %v1175_v47 = vrot.slane %v1174_v46, 4  ;;  %v1153_v48 = vpop.permute.xlu0 %1152 }
 0x1a0   : > { %v1184_v49 = vsel %vm1027_vm0, %v1175_v47, 0  ;;  %2762 = vmatmul.msk.bf16.vlgmr.msrb.gmra.mxu2 %vm1027_vm0, %v1153_v48 }
 0x1a1   : > { %1193 = vmatpush.bf16.xpose.msra.mxu2 %v1184_v49 }
 0x1a5   : > { %v1179_v55 = vpop.permute.xlu1 %1178 }
 0x1a6   : > { %v1292_v56 = vpop.permute.xlu0 %1291 }
 0x1a7   : > { %2766 = vmatmul.msk.bf16.vlgmr.msrb.gmra.mxu1 %vm1027_vm0, %v1292_v56  ;;  %v1252_v56 = vunpack.c.l.b16 %v1024_v23 }
 0x1a9   : > { %1330 = vmatpush.bf16.xpose.msrb.mxu2 %v1321_v52 }
 0x1ad   : > { %v1316_v59 = vpop.permute.xlu1 %1315 }
 0x1ae   : > { %v1444_v60 = vpop.permute.xlu0 %1443 }
 0x1af   : > { %v1445_v61 = vrot.slane %v1444_v60, 4  ;;  %v3889_v60 = vpack.c.b16 %v1252_v56, %v1252_v56 }
 0x1b0   : > { %v1043_v63 = vpop.f32.mrf.mxu3  ;;  %2763 = vmatmul.msk.bf16.vlgmr.msra.gmra.mxu2 %vm1027_vm0, %v1179_v55 }
 0x1b1   : > { %v1452_v0 = vsel %vm1027_vm0, %v1445_v61, 0  ;;  %v1068_v1 = vmul.f32 0.17677669, %v1043_v63 }
 0x1b2   : > { %1461 = vmatpush.bf16.xpose.msra.mxu2 %v1452_v0 }
 0x1b3   : > { %v1076_v2 = vadd.f32 %v3859_v62, %v1068_v1 }
 0x1b5   : > { %v1423_v3 = vpop.permute.xlu1 %1422  ;;  %v1079_v4 = vsel %vm1078_vm1, %v1076_v2, -inf }
 0x1b6   : > { %1080 = vmax.xlane.f32.xlu0 %v1079_v4 }
 0x1b7   : > { %2770 = vmatmul.msk.bf16.vlgmr.msra.gmra.mxu1 %vm1027_vm0, %v1423_v3 }
 0x1b8   : > { %v1045_v5 = vpop.f32.mrf.mxu3 }
 0x1c0   : > { %v1064_v8 = vpop.f32.mrf.mxu3  ;;  %2767 = vmatmul.msk.bf16.vlgmr.msrb.gmra.mxu2 %vm1027_vm0, %v1316_v59 }
 0x1c1   : > { %v1069_v9 = vmul.f32 0.17677669, %v1064_v8 }
 0x1c3   : > { %v1077_v10 = vadd.f32 %v3866_v7, %v1069_v9 }
 0x1c5   : > { %v1082_v11 = vsel %vm1078_vm1, %v1077_v10, -inf }
 0x1c6   : > { %1083 = vmax.xlane.f32.xlu1 %v1082_v11 }
 0x1c8   : > { %v1066_v12 = vpop.f32.mrf.mxu3 }
 0x1d0   : > { %2771 = vmatmul.msk.bf16.vlgmr.msra.gmra.mxu2 %vm1027_vm0, %v1447_v13 }
 0x1df   : > { %1364 = vrot.lane.b32.xlu1 %v3874_v20, %s3477_s4 }
 0x223   : > { %v1169_v54 = vpop.f32.mrf.mxu2 }
 0x224   : > { %v1199_v25 = vmul.f32 0.17677669, %v1169_v54  ;;  %v1308_v26 = vpop.f32.mrf.mxu1 }
 0x225   : > { %v1336_v27 = vmul.f32 0.17677669, %v1308_v26 }
 0x226   : > { %v1201_v28 = vadd.f32 %v1199_v25, %v3859_v62 }
 0x227   : > { %v1338_v29 = vadd.f32 %v1336_v27, %v3859_v62 }
 0x228   : > { %v1203_v30 = vsel %vm1078_vm1, %v1201_v28, -inf }
 0x229   : > { %1204 = vmax.xlane.f32.xlu2 %v1203_v30  ;;  %v1340_v31 = vsel %vm1078_vm1, %v1338_v29, -inf  ;;  %v1081_v32 = vpop.xlane.xlu0 %1080 }
 0x22a   : > { %1341 = vmax.xlane.f32.xlu0 %v1340_v31  ;;  %v1085_v33 = vsub.f32 %v1076_v2, %v1081_v32 }
 0x22b   : > { %v1171_v34 = vpop.f32.mrf.mxu2 }
 0x22c   : > { %v1087_v35 = vmul.f32 1.442695, %v1085_v33  ;;  %v1310_v36 = vpop.f32.mrf.mxu1 }
 0x22e   : > { %3247 = vpow2.f32 %v1087_v35 }
 0x233   : > { %v1195_v37 = vpop.f32.mrf.mxu2 }
 0x234   : > { %v3248_v38 = vpop.eup %3247  ;;  %v1200_v39 = vmul.f32 0.17677669, %v1195_v37  ;;  %v1439_v40 = vpop.f32.mrf.mxu1 }
 0x235   : > { %v1091_v41 = vsel %vm1078_vm1, %v3248_v38, 0.0  ;;  %v1467_v43 = vmul.f32 0.17677669, %v1439_v40 }
 0x236   : > { %1092 = vadd.xlane.f32.xlu0 %v1091_v41  ;;  %v1202_v42 = vadd.f32 %v1200_v39, %v3866_v7 }
 0x237   : > { %v1469_v52 = vadd.f32 %v1467_v43, %v3859_v62 }
 0x238   : > { %v1206_v44 = vsel %vm1078_vm1, %v1202_v42, -inf }
 0x239   : > { %1207 = vmax.xlane.f32.xlu2 %v1206_v44  ;;  %v1084_v45 = vpop.xlane.xlu1 %1083  ;;  %v1471_v53 = vsel %vm1078_vm1, %v1469_v52, -inf }
 0x23a   : > { %v1086_v46 = vsub.f32 %v1077_v10, %v1084_v45 }
 0x23b   : > { %v1197_v47 = vpop.f32.mrf.mxu2 }
 0x23c   : > { %v1089_v48 = vmul.f32 1.442695, %v1086_v46  ;;  %v1441_v49 = vpop.f32.mrf.mxu1 }
 0x23e   : > { %3249 = vpow2.f32 %v1089_v48 }
 0x241   : > { %1472 = vmax.xlane.f32.xlu2 %v1471_v53 }
 0x243   : > { %v1332_v55 = vpop.f32.mrf.mxu2 }
 0x244   : > { %v1337_v57 = vmul.f32 0.17677669, %v1332_v55  ;;  %v3250_v58 = vpop.eup %3249 }
 0x245   : > { %v1094_v63 = vsel %vm1078_vm1, %v3250_v58, 0.0 }
 0x246   : > { %v1339_v59 = vadd.f32 %v1337_v57, %v3866_v7 }
 0x248   : > { %v1343_v61 = vsel %vm1078_vm1, %v1339_v59, -inf }
 0x249   : > { %1344 = vmax.xlane.f32.xlu1 %v1343_v61  ;;  %1095 = vadd.xlane.f32.xlu2 %v1094_v63 }
 0x24a   : > { %1254 = vrot.lane.b32.xlu0 %v3889_v60, %s3478_s24 }
 0x24b   : > { %v1334_v62 = vpop.f32.mrf.mxu2 }
 0x251   : > { %v1365_v24 = vpop.permute.xlu1 %1364 }
 0x252   : > { %v1370_v40 = vsel %vm1106_vm2, %v1365_v24, 0 }
 0x253   : > { %v1463_v0 = vpop.f32.mrf.mxu2 }
 0x254   : > { %v1468_v1 = vmul.f32 0.17677669, %v1463_v0 }
 0x256   : > { %v3896_v2 = vadd.f32 %v1468_v1, %v3866_v7 }
 0x258   : > { %v1474_v3 = vsel %vm1078_vm1, %v3896_v2, -inf }
 0x259   : > { %1475 = vmax.xlane.f32.xlu1 %v1474_v3 }
 0x25b   : > { %v1465_v4 = vpop.f32.mrf.mxu2 }
 0x261   : > { %1230 = vrot.lane.b32.xlu2 %v3874_v20, %s3478_s24 }
 0x29c   : > { %v1205_v5 = vpop.xlane.xlu2 %1204 }
 0x29d   : > { %v1209_v6 = vsub.f32 %v1201_v28, %v1205_v5  ;;  %v1342_v8 = vpop.xlane.xlu0 %1341 }
 0x29e   : > { %v1346_v9 = vsub.f32 %v1338_v29, %v1342_v8 }
 0x29f   : > { %v1211_v10 = vmul.f32 1.442695, %v1209_v6 }
 0x2a0   : > { %v1348_v11 = vmul.f32 1.442695, %v1346_v9 }
 0x2a1   : > { %3251 = vpow2.f32 %v1211_v10 }
 0x2a2   : > { %3253 = vpow2.f32 %v1348_v11 }
 0x2a7   : > { %v3252_v12 = vpop.eup %3251 }
 0x2a8   : > { %v3902_v13 = vpop.eup %3253  ;;  %v1215_v7 = vsel %vm1078_vm1, %v3252_v12, 0.0 }
 0x2a9   : > { %1216 = vadd.xlane.f32.xlu0 %v1215_v7  ;;  %v1093_v14 = vpop.xlane.xlu0 %1092  ;;  %v1352_v15 = vsel %vm1078_vm1, %v3902_v13, 0.0 }
 0x2aa   : > { %3255 = vrcp.f32 %v1093_v14  ;;  %1353 = vadd.xlane.f32.xlu1 %v1352_v15 }
 0x2ac   : > { %v1208_v16 = vpop.xlane.xlu2 %1207 }
 0x2ad   : > { %v1210_v17 = vsub.f32 %v1202_v42, %v1208_v16 }
 0x2af   : > { %v1213_v18 = vmul.f32 1.442695, %v1210_v17 }
 0x2b0   : > { %v3256_v19 = vpop.eup %3255 }
 0x2b1   : > { %v1099_v21 = vmul.f32 %v3256_v19, %v3248_v38  ;;  %3257 = vpow2.f32 %v1213_v18 }
 0x2b3   : > { %v1101_v22 = vpack.c.bf16 %v1099_v21, %v1099_v21 }
 0x2b4   : > { %v1473_v23 = vpop.xlane.xlu2 %1472 }
 0x2b5   : > { %v1477_v54 = vsub.f32 %v1469_v52, %v1473_v23  ;;  %2760 = vmatmul.msk.bf16.vlgmr.msra.gmra.mxu3 %vm1078_vm1, %v1101_v22 }
 0x2b7   : > { %v3258_v25 = vpop.eup %3257  ;;  %v1479_v26 = vmul.f32 1.442695, %v1477_v54 }
 0x2b8   : > { %v1218_v27 = vsel %vm1078_vm1, %v3258_v25, 0.0 }
 0x2b9   : > { %3259 = vpow2.f32 %v1479_v26  ;;  %1219 = vadd.xlane.f32.xlu1 %v1218_v27 }
 0x2bc   : > { %v1255_v28 = vpop.permute.xlu0 %1254  ;;  %v1096_v29 = vpop.xlane.xlu2 %1095 }
 0x2bd   : > { %v1260_v30 = vsel %vm1106_vm2, %v1255_v28, 0  ;;  %3261 = vrcp.f32 %v1096_v29  ;;  %v1345_v31 = vpop.xlane.xlu1 %1344  ;;  %1385 = vrot.lane.b32.xlu0 %v3889_v60, %s3477_s4 }
 0x2be   : > { %v1347_v32 = vsub.f32 %v1339_v59, %v1345_v31  ;;  %1269 = vmatpush.bf16.msra.mxu0 %v1260_v30 }
 0x2bf   : > { %v3912_v33 = vpop.eup %3259 }
 0x2c0   : > { %v1350_v34 = vmul.f32 1.442695, %v1347_v32  ;;  %v1483_v35 = vsel %vm1078_vm1, %v3912_v33, 0.0 }
 0x2c1   : > { %1484 = vadd.xlane.f32.xlu2 %v1483_v35 }
 0x2c2   : > { %3263 = vpow2.f32 %v1350_v34 }
 0x2c3   : > { %v3262_v36 = vpop.eup %3261 }
 0x2c4   : > { %v1100_v37 = vmul.f32 %v3262_v36, %v3250_v58  ;;  %v1231_v38 = vpop.permute.xlu2 %1230 }
 0x2c5   : > { %v1236_v39 = vsel %vm1106_vm2, %v1231_v38, 0 }
 0x2c6   : > { %1245 = vmatpush.bf16.msrb.mxu3 %v1236_v39  ;;  %v1102_v41 = vpack.c.bf16 %v1100_v37, %v1100_v37 }
 0x2c8   : > { %v3264_v42 = vpop.eup %3263  ;;  %2761 = vmatmul.msk.bf16.vlgmr.msrb.gmra.mxu0 %vm1078_vm1, %v1102_v41 }
 0x2c9   : > { %v1355_v43 = vsel %vm1078_vm1, %v3264_v42, 0.0 }
 0x2ca   : > { %1379 = vmatpush.bf16.msra.mxu3 %v1370_v40  ;;  %1356 = vadd.xlane.f32.xlu1 %v1355_v43  ;;  %v3105_v43 = vld [vmem:[%s3723_s2 + $0x30] sm:$0xff] }
 0x2cc   : > { %v1476_v44 = vpop.xlane.xlu1 %1475 }
 0x2cd   : > { %v1478_v45 = vsub.f32 %v3896_v2, %v1476_v44 }
 0x2cf   : > { %v1481_v46 = vmul.f32 1.442695, %v1478_v45  ;;  %v3104_v45 = vld [vmem:[%s3723_s2 + $0x28] sm:$0xff] }
 0x2d1   : > { %3265 = vpow2.f32 %v1481_v46  ;;  %v3103_v46 = vld [vmem:[%s3723_s2 + $0x20] sm:$0xff] }
 0x2d7   : > { %v3266_v47 = vpop.eup %3265 }
 0x2d8   : > { %v1486_v48 = vsel %vm1078_vm1, %v3266_v47, 0.0 }
 0x2e3   : > { %1495 = vrot.lane.b32.xlu1 %v3874_v20, %s3479_s25 }
 0x2e7   : > { %1487 = vadd.xlane.f32.xlu0 %v1486_v48  ;;  %v3102_v48 = vld [vmem:[%s3723_s2 + $0x18] sm:$0xff] }
 0x2eb   : > { %1516 = vrot.lane.b32.xlu1 %v3889_v60, %s3479_s25 }
 0x31c   : > { %v1217_v49 = vpop.xlane.xlu0 %1216 }
 0x31d   : > { %3267 = vrcp.f32 %v1217_v49  ;;  %v1354_v55 = vpop.xlane.xlu1 %1353  ;;  %v3101_v49 = vld [vmem:[%s3723_s2 + $0x10] sm:$0xff] }
 0x31e   : > { %3269 = vrcp.f32 %v1354_v55  ;;  %v3099_v55 = vld [vmem:[%s3723_s2] sm:$0xff] }
 0x323   : > { %v3268_v52 = vpop.eup %3267 }
 0x324   : > { %v1223_v53 = vmul.f32 %v3268_v52, %v3252_v12  ;;  %v3270_v58 = vpop.eup %3269 }
 0x325   : > { %v1360_v61 = vmul.f32 %v3270_v58, %v3902_v13 }
 0x326   : > { %v1225_v56 = vpack.c.bf16 %v1223_v53, %v1223_v53  ;;  %v3100_v53 = vld [vmem:[%s3723_s2 + $0x8] sm:$0xff] }
 0x327   : > { %v1362_v62 = vpack.c.bf16 %v1360_v61, %v1360_v61 }
 0x328   : > { %2764 = vmatmul.msk.bf16.vlgmr.msrb.gmra.mxu3 %vm1078_vm1, %v1225_v56 }
 0x32c   : > { %v1220_v57 = vpop.xlane.xlu1 %1219 }
 0x32d   : > { %3271 = vrcp.f32 %v1220_v57 }
 0x32f   : > { %v1386_v59 = vpop.permute.xlu0 %1385 }
 0x330   : > { %v1391_v20 = vsel %vm1106_vm2, %v1386_v59, 0  ;;  %v3241_v59 = vld [vmem:[%s4231_s20] ss:$0 sm:$0xff] }
 0x331   : > { %1400 = vmatpush.bf16.msrb.mxu0 %v1391_v20 }
 0x333   : > { %v3272_v63 = vpop.eup %3271 }
 0x334   : > { %v1224_v60 = vmul.f32 %v3272_v63, %v3258_v25  ;;  %v1485_v11 = vpop.xlane.xlu2 %1484 }
 0x336   : > { %v1226_v0 = vpack.c.bf16 %v1224_v60, %v1224_v60 }
 0x338   : > { %v1119_v1 = vpop.f32.mrf.mxu3  ;;  %2765 = vmatmul.msk.bf16.vlgmr.msra.gmra.mxu0 %vm1078_vm1, %v1226_v0  ;;  %2768 = vmatmul.msk.bf16.vlgmr.msra.gmra.mxu3 %vm1078_vm1, %v1362_v62 }
 0x339   : > { %v1142_v2 = vpack.c.bf16 %v1119_v1, %v1119_v1  ;;  %v3480_v1 = vmov 128.0  }
 0x33b   : > { %1145 = vst.msk [vmem:[#allocation3] sm:$0xf] %vm1144_vm3, %v1142_v2 }
 0x33d   : > { %v1357_v3 = vpop.xlane.xlu1 %1356 }
 0x33e   : > { %3273 = vrcp.f32 %v1357_v3 }
 0x33f   : > { %3275 = vrcp.f32 %v1485_v11 }
 0x340   : > { %v1121_v4 = vpop.f32.mrf.mxu3 }
 0x344   : > { %v3274_v5 = vpop.eup %3273 }
 0x345   : > { %v1361_v6 = vmul.f32 %v3274_v5, %v3264_v42  ;;  %v1138_v8 = vpop.f32.mrf.mxu0  ;;  %v3276_v13 = vpop.eup %3275  ;;  %v3106_v42 = vld [vmem:[%s3723_s2 + $0x38] sm:$0xff] }
 0x346   : > { %v1143_v9 = vpack.c.bf16 %v1138_v8, %v1138_v8  ;;  %v1491_v7 = vmul.f32 %v3276_v13, %v3912_v33  ;;  %1626 = vmatpush.bf16.msrb.mxu1 %v3106_v42  ;;  %v2894_v42 = vld [vmem:[%s3708_s18 + $0xb0] sm:$0xf0] }
 0x347   : > { %v1363_v10 = vpack.c.bf16 %v1361_v6, %v1361_v6 }
 0x348   : > { %1146 = vst.msk [vmem:[#allocation3 + $0x4] sm:$0xf] %vm1144_vm3, %v1143_v9  ;;  %v1493_v16 = vpack.c.bf16 %v1491_v7, %v1491_v7 }
 0x349   : > { %2769 = vmatmul.msk.bf16.vlgmr.msrb.gmra.mxu0 %vm1078_vm1, %v1363_v10 }
 0x34a   : > { %1627 = vmatpush.bf16.msrb.mxu1 %v3105_v43  ;;  %v2900_v43 = vld [vmem:[%s3708_s18 + $0xa8] sm:$0xf] }
 0x34d   : > { %v1140_v12 = vpop.f32.mrf.mxu0 }
 0x34e   : > { %1628 = vmatpush.bf16.msrb.mxu1 %v3104_v45 }
 0x352   : > { %1629 = vmatpush.bf16.msrb.mxu1 %v3103_v46 }
 0x355   : > { %v1496_v14 = vpop.permute.xlu1 %1495 }
 0x356   : > { %v1501_v15 = vsel %vm1106_vm2, %v1496_v14, 0  ;;  %1630 = vmatpush.bf16.msrb.mxu1 %v3102_v48  ;;  %v2924_v14 = vld [vmem:[%s3708_s18 + $0xe0] sm:$0xf]  ;;  %v2902_v48 = vld [vmem:[%s3708_s18 + $0xb8] sm:$0xf0] }
 0x357   : > { %1510 = vmatpush.bf16.msrb.mxu3 %v1501_v15  ;;  %v3137_v15 = vld [vmem:[%s3708_s18 + $0xec] sm:$0xf0] }
 0x35a   : > { %2772 = vmatmul.msk.bf16.vlgmr.msrb.gmra.mxu3 %vm1078_vm1, %v1493_v16  ;;  %v1488_v17 = vpop.xlane.xlu0 %1487  ;;  %1631 = vmatpush.bf16.msrb.mxu1 %v3101_v49  ;;  %v3135_v16 = vld [vmem:[%s3708_s18 + $0xe4] sm:$0xf] }
 0x35b   : > { %3277 = vrcp.f32 %v1488_v17  ;;  %v2925_v17 = vor.u32 %v3137_v15, %v2924_v14  ;;  %v3117_v14 = vld [vmem:[%s3708_s18 + $0x4c] sm:$0xf0]  ;;  %v3115_v15 = vld [vmem:[%s3708_s18 + $0x44] sm:$0xf] }
 0x35c   : > { %3279 = vrcp.f32 %v3480_v1  ;;  %v3121_v1 = vld [vmem:[%s3708_s18 + $0x6c] sm:$0xf0] }
 0x35d   : > { %v1517_v18 = vpop.permute.xlu1 %1516  ;;  %1904 = vmatpush.bf16.msrb.mxu2 %v2925_v17  ;;  %v2846_v17 = vld [vmem:[%s3708_s18 + $0x50] sm:$0xf0] }
 0x35e   : > { %v1522_v19 = vsel %vm1106_vm2, %v1517_v18, 0  ;;  %1632 = vmatpush.bf16.msrb.mxu1 %v3100_v53  ;;  %v2926_v18 = vld [vmem:[%s3708_s18 + $0xf0] sm:$0xf0]  ;;  %v3125_v53 = vld [vmem:[%s3708_s18 + $0x8c] sm:$0xf0] }
 0x35f   : > { %1531 = vmatpush.bf16.msra.mxu0 %v1522_v19  ;;  %v2932_v19 = vld [vmem:[%s3708_s18 + $0xe8] sm:$0xf] }
 0x361   : > { %v3278_v21 = vpop.eup %3277 }
 0x362   : > { %v1492_v22 = vmul.f32 %v3278_v21, %v3266_v47  ;;  %1633 = vmatpush.bf16.msrb.mxu1 %v3099_v55  ;;  %v3280_v2 = vpop.eup %3279  ;;  %v3138_v21 = vld [vmem:[%s3708_s18 + $0xf4] sm:$0xf0]  ;;  %v3123_v55 = vld [vmem:[%s3708_s18 + $0x84] sm:$0xf] }
 0x363   : > { %v1649_v3 = vmul.f32 128.0, %v3280_v2  ;;  %vm1653_vm7 = vweird.f32 %v3280_v2 }
 0x364   : > { %v1494_v23 = vpack.c.bf16 %v1492_v22, %v1492_v22  ;;  %v2929_v22 = vor.u32 %v3135_v16, %v2926_v18  ;;  %v2852_v18 = vld [vmem:[%s3708_s18 + $0x48] sm:$0xf] }
 0x365   : > { %v1650_v4 = vsub.f32 1.0, %v1649_v3 }
 0x366   : > { %2773 = vmatmul.msk.bf16.vlgmr.msra.gmra.mxu0 %vm1078_vm1, %v1494_v23  ;;  %v2933_v23 = vor.u32 %v3138_v21, %v2932_v19  ;;  %1918 = vmatpush.bf16.msra.mxu3 %v2929_v22  ;;  %v3118_v19 = vld [vmem:[%s3708_s18 + $0x54] sm:$0xf0]  ;;  %v2849_v21 = vor.u32 %v3115_v15, %v2846_v17  ;;  %v3161_v17 = vld [vmem:[%s3760_s29 + $0xb0] sm:$0xff] }
 0x367   : > { %v1651_v5 = vmul.f32 %v3280_v2, %v1650_v4  ;;  %v2862_v4 = vld [vmem:[%s3708_s18 + $0x70] sm:$0xf0]  ;;  %v2853_v22 = vor.u32 %v3118_v19, %v2852_v18  ;;  %v3146_v19 = vld [vmem:[%s3760_s29 + $0x38] sm:$0xff] }
 0x368   : > { %1932 = vmatpush.bf16.msrb.mxu0 %v2933_v23  ;;  %v3116_v23 = vld [vmem:[%s3708_s18 + $0x4c] sm:$0xf]  ;;  %v3169_v18 = vld [vmem:[%s3760_s29 + $0xf0] sm:$0xff] }
 0x369   : > { %v1652_v6 = vadd.f32 %v3280_v2, %v1651_v5  ;;  %v2868_v5 = vld [vmem:[%s3708_s18 + $0x68] sm:$0xf] }
 0x36b   : > { %v3958_v8 = vsel %vm1653_vm7, %v3280_v2, %v1652_v6  ;;  %v3119_v2 = vld [vmem:[%s3708_s18 + $0x64] sm:$0xf]  ;;  %v3122_v6 = vld [vmem:[%s3708_s18 + $0x74] sm:$0xf0] }
 0x3ab   : > { %v1247_v24 = vpop.f32.mrf.mxu3 }
 0x3ac   : > { %v1275_v54 = vpack.c.bf16 %v1247_v24, %v1247_v24  ;;  %v3136_v24 = vld [vmem:[%s3708_s18 + $0xec] sm:$0xf] }
 0x3ae   : > { %1279 = vrot.lane.b32.xlu1 %v1275_v54, %s3479_s25  ;;  %v2934_v54 = vld [vmem:[%s3708_s18 + $0xf8] sm:$0xf0] }
 0x3b3   : > { %v1249_v25 = vpop.f32.mrf.mxu3 }
 0x3b4   : > { %v2937_v25 = vor.u32 %v3136_v24, %v2934_v54  ;;  %v2854_v24 = vld [vmem:[%s3708_s18 + $0x58] sm:$0xf0] }
 0x3b5   : > { %v1271_v26 = vpop.f32.mrf.mxu0  ;;  %v2857_v54 = vor.u32 %v3116_v23, %v2854_v24  ;;  %v3168_v23 = vld [vmem:[%s3760_s29 + $0xe8] sm:$0xff]  ;;  %v3145_v24 = vld [vmem:[%s3760_s29 + $0x30] sm:$0xff] }
 0x3b6   : > { %v1276_v27 = vpack.c.bf16 %v1271_v26, %v1271_v26  ;;  %v2908_v26 = vld [vmem:[%s3708_s18 + $0xc0] sm:$0xf]  ;;  %1946 = vmatpush.bf16.msra.mxu1 %v2937_v25 }
 0x3b7   : > { %v2828_v25 = vld [vmem:[%s3708_s18 + $0x20] sm:$0xf] }
 0x3b8   : > { %1281 = vrot.lane.b32.xlu2 %v1276_v27, %s3479_s25  ;;  %v3133_v27 = vld [vmem:[%s3708_s18 + $0xcc] sm:$0xf0] }
 0x3bb   : > { %v1381_v28 = vpop.f32.mrf.mxu3 }
 0x3bc   : > { %v1406_v29 = vpack.c.bf16 %v1381_v28, %v1381_v28  ;;  %v3131_v28 = vld [vmem:[%s3708_s18 + $0xc4] sm:$0xf] }
 0x3bd   : > { %v1273_v30 = vpop.f32.mrf.mxu0 }
 0x3be   : > { %1410 = vrot.lane.b32.xlu1 %v1406_v29, %s3477_s4  ;;  %v2909_v29 = vor.u32 %v3133_v27, %v2908_v26  ;;  %v2910_v30 = vld [vmem:[%s3708_s18 + $0xd0] sm:$0xf0]  ;;  %v3113_v26 = vld [vmem:[%s3708_s18 + $0x2c] sm:$0xf0]  ;;  %v3111_v27 = vld [vmem:[%s3708_s18 + $0x24] sm:$0xf] }
 0x3c0   : > { %1905 = vmatpush.bf16.msrb.mxu2 %v2909_v29  ;;  %v2830_v29 = vld [vmem:[%s3708_s18 + $0x30] sm:$0xf0] }
 0x3c3   : > { %v1383_v31 = vpop.f32.mrf.mxu3 }
 0x3c4   : > { %v2916_v31 = vld [vmem:[%s3708_s18 + $0xc8] sm:$0xf] }
 0x3c6   : > { %v1402_v32 = vpop.f32.mrf.mxu0 }
 0x3c7   : > { %v1407_v33 = vpack.c.bf16 %v1402_v32, %v1402_v32  ;;  %v3134_v32 = vld [vmem:[%s3708_s18 + $0xd4] sm:$0xf0] }
 0x3c9   : > { %1412 = vrot.lane.b32.xlu0 %v1407_v33, %s3477_s4  ;;  %v2913_v33 = vor.u32 %v3131_v28, %v2910_v30  ;;  %v2829_v28 = vor.u32 %v3113_v26, %v2828_v25  ;;  %v2836_v30 = vld [vmem:[%s3708_s18 + $0x28] sm:$0xf]  ;;  %v3159_v25 = vld [vmem:[%s3760_s29 + $0xa0] sm:$0xff] }
 0x3ca   : > { %v3167_v26 = vld [vmem:[%s3760_s29 + $0xe0] sm:$0xff] }
 0x3cb   : > { %1919 = vmatpush.bf16.msra.mxu3 %v2913_v33 }
 0x3ce   : > { %v1404_v34 = vpop.f32.mrf.mxu0 }
 0x3cf   : > { %v2917_v34 = vor.u32 %v3134_v32, %v2916_v31  ;;  %v3114_v31 = vld [vmem:[%s3708_s18 + $0x34] sm:$0xf0]  ;;  %v2833_v32 = vor.u32 %v3111_v27, %v2830_v29  ;;  %v3144_v27 = vld [vmem:[%s3760_s29 + $0x28] sm:$0xff] }
 0x3d0   : > { %v2837_v33 = vor.u32 %v3114_v31, %v2836_v30  ;;  %v3158_v29 = vld [vmem:[%s3760_s29 + $0x98] sm:$0xff]  ;;  %v3143_v31 = vld [vmem:[%s3760_s29 + $0x20] sm:$0xff] }
 0x3d1   : > { %1933 = vmatpush.bf16.msrb.mxu0 %v2917_v34  ;;  %v3112_v34 = vld [vmem:[%s3708_s18 + $0x2c] sm:$0xf]  ;;  %v3166_v30 = vld [vmem:[%s3760_s29 + $0xd8] sm:$0xff] }
 0x3dd   : > { %v1512_v35 = vpop.f32.mrf.mxu3 }
 0x3de   : > { %v1537_v36 = vpack.c.bf16 %v1512_v35, %v1512_v35  ;;  %v3132_v35 = vld [vmem:[%s3708_s18 + $0xcc] sm:$0xf] }
 0x3e0   : > { %1541 = vrot.lane.b32.xlu1 %v1537_v36, %s3478_s24  ;;  %v2918_v36 = vld [vmem:[%s3708_s18 + $0xd8] sm:$0xf0] }
 0x3e3   : > { %v1533_v37 = vpop.f32.mrf.mxu0 }
 0x3e4   : > { %v1538_v38 = vpack.c.bf16 %v1533_v37, %v1533_v37  ;;  %v2921_v37 = vor.u32 %v3132_v35, %v2918_v36  ;;  %v2838_v35 = vld [vmem:[%s3708_s18 + $0x38] sm:$0xf0]  ;;  %v2812_v36 = vld [vmem:[%s3708_s18] sm:$0xf] }
 0x3e5   : > { %v1514_v39 = vpop.f32.mrf.mxu3 }
 0x3e6   : > { %v3129_v39 = vld [vmem:[%s3708_s18 + $0xac] sm:$0xf0]  ;;  %1947 = vmatpush.bf16.msra.mxu1 %v2921_v37 }
 0x3e8   : > { %1543 = vrot.lane.b32.xlu1 %v1538_v38, %s3478_s24  ;;  %v2892_v38 = vld [vmem:[%s3708_s18 + $0xa0] sm:$0xf] }
 0x3eb   : > { %v1535_v40 = vpop.f32.mrf.mxu0 }
 0x3ec   : > { %v3127_v40 = vld [vmem:[%s3708_s18 + $0xa4] sm:$0xf] }
 0x3ed   : > { %v2897_v45 = vor.u32 %v3127_v40, %v2894_v42  ;;  %v3107_v40 = vld [vmem:[%s3708_s18 + $0x4] sm:$0xf] }
 0x3ef   : > { %1920 = vmatpush.bf16.msra.mxu3 %v2897_v45  ;;  %v2820_v45 = vld [vmem:[%s3708_s18 + $0x8] sm:$0xf] }
 0x412   : > { %v1282_v41 = vpop.permute.xlu2 %1281 }
 0x413   : > { %1287 = vst.msk [vmem:[#allocation3 + $0x4] sm:$0xf] %vm1285_vm4, %v1282_v41  ;;  %v2893_v41 = vor.u32 %v3129_v39, %v2892_v38  ;;  %v2841_v38 = vor.u32 %v3112_v34, %v2838_v35  ;;  %v3109_v39 = vld [vmem:[%s3708_s18 + $0xc] sm:$0xf0]  ;;  %v4075_v35 = vld [vmem:[%s3746_s3] sm:$0xf] }
 0x414   : > { %v3165_v34 = vld [vmem:[%s3760_s29 + $0xd0] sm:$0xff] }
 0x415   : > { %1906 = vmatpush.bf16.msrb.mxu2 %v2893_v41  ;;  %v2814_v41 = vld [vmem:[%s3708_s18 + $0x10] sm:$0xf0] }
 0x420   : > { %v1280_v44 = vpop.permute.xlu1 %1279 }
 0x421   : > { %1286 = vst.msk [vmem:[#allocation3] sm:$0xf] %vm1285_vm4, %v1280_v44  ;;  %v3130_v44 = vld [vmem:[%s3708_s18 + $0xb4] sm:$0xf0] }
 0x422   : > { %v2901_v46 = vor.u32 %v3130_v44, %v2900_v43  ;;  %v2813_v43 = vor.u32 %v3109_v39, %v2812_v36  ;;  %v2817_v44 = vor.u32 %v3107_v40, %v2814_v41  ;;  %v3142_v36 = vld [vmem:[%s3760_s29 + $0x18] sm:$0xff]  ;;  %v3164_v39 = vld [vmem:[%s3760_s29 + $0xc8] sm:$0xff]  ;;  %v1738_v40 = vperm.slane %v4075_v35, 2 }
 0x423   : > { %v1739_v41 = vperm.slane %v4075_v35, 3 }
 0x424   : > { %1934 = vmatpush.bf16.msrb.mxu0 %v2901_v46  ;;  %v3110_v46 = vld [vmem:[%s3708_s18 + $0x14] sm:$0xf0] }
 0x430   : > { %v1411_v47 = vpop.permute.xlu1 %1410 }
 0x431   : > { %1417 = vst.msk [vmem:[#allocation3] sm:$0xf] %vm1416_vm5, %v1411_v47  ;;  %v3128_v47 = vld [vmem:[%s3708_s18 + $0xac] sm:$0xf] }
 0x432   : > { %v2905_v49 = vor.u32 %v3128_v47, %v2902_v48  ;;  %v3108_v47 = vld [vmem:[%s3708_s18 + $0xc] sm:$0xf]  ;;  %v2821_v48 = vor.u32 %v3110_v46, %v2820_v45  ;;  %v3155_v46 = vld [vmem:[%s3760_s29 + $0x80] sm:$0xff] }
 0x434   : > { %1948 = vmatpush.bf16.msra.mxu1 %v2905_v49  ;;  %v2822_v49 = vld [vmem:[%s3708_s18 + $0x18] sm:$0xf0] }
 0x43b   : > { %v1413_v52 = vpop.permute.xlu0 %1412 }
 0x43c   : > { %1418 = vst.msk [vmem:[#allocation3 + $0x4] sm:$0xf] %vm1416_vm5, %v1413_v52  ;;  %v2876_v52 = vld [vmem:[%s3708_s18 + $0x80] sm:$0xf] }
 0x452   : > { %v1542_v56 = vpop.permute.xlu1 %1541 }
 0x453   : > { %1548 = vst.msk [vmem:[#allocation3] sm:$0xf] %vm1547_vm6, %v1542_v56  ;;  %v2877_v56 = vor.u32 %v3125_v53, %v2876_v52  ;;  %v2825_v53 = vor.u32 %v3108_v47, %v2822_v49  ;;  %v3163_v47 = vld [vmem:[%s3760_s29 + $0xc0] sm:$0xff] }
 0x455   : > { %1907 = vmatpush.bf16.msrb.mxu2 %v2877_v56 }
 0x45a   : > { %v1544_v57 = vpop.permute.xlu1 %1543 }
 0x45b   : > { %1549 = vst.msk [vmem:[#allocation3 + $0x4] sm:$0xf] %vm1547_vm6, %v1544_v57  ;;  %v2878_v57 = vld [vmem:[%s3708_s18 + $0x90] sm:$0xf0] }
 0x462   : > { %v3098_v58 = vld [vmem:[#allocation3] sm:$0xff] }
 0x463   : > { %1634 = vmatmul.bf16.vlgmr.msrb.gmra.mxu1 %v3098_v58  ;;  %v2884_v58 = vld [vmem:[%s3708_s18 + $0x88] sm:$0xf] }
 0x4e0   : > { %v1635_v20 = vpop.f32.mrf.mxu1 }
 0x4e1   : > { %v1636_v61 = vadd.f32 %v3241_v59, %v1635_v20  ;;  %v2881_v20 = vor.u32 %v3123_v55, %v2878_v57 }
 0x4e3   : > { %v1640_v63 = vadd.f32 %v1636_v61, %v3801_v50  ;;  %1921 = vmatpush.bf16.msra.mxu3 %v2881_v20 }
 0x4e5   : > { %1644 = vadd.xlane.f32.xlu2 %v1640_v63 }
 0x4e8   : > { %v1637_v60 = vpop.f32.mrf.mxu1 }
 0x4e9   : > { %v1638_v62 = vadd.f32 %v3241_v59, %v1637_v60  ;;  %v3126_v59 = vld [vmem:[%s3708_s18 + $0x94] sm:$0xf0]  ;;  %v2886_v60 = vld [vmem:[%s3708_s18 + $0x98] sm:$0xf0] }
 0x4ea   : > { %v2885_v61 = vor.u32 %v3126_v59, %v2884_v58 }
 0x4eb   : > { %v1641_v0 = vadd.f32 %v1638_v62, %v3803_v51 }
 0x4ec   : > { %1935 = vmatpush.bf16.msrb.mxu0 %v2885_v61 }
 0x4ed   : > { %1646 = vadd.xlane.f32.xlu1 %v1641_v0 }
 0x558   : > { %v1645_v50 = vpop.xlane.xlu2 %1644 }
 0x559   : > { %v1655_v51 = vmul.f32 %v3958_v8, %v1645_v50  ;;  %v2865_v50 = vor.u32 %v3119_v2, %v2862_v4 }
 0x55b   : > { %v3961_v9 = vsub.f32 %v1640_v63, %v1655_v51  ;;  %v3124_v63 = vld [vmem:[%s3708_s18 + $0x8c] sm:$0xf]  ;;  %v2869_v51 = vor.u32 %v3122_v6, %v2868_v5  ;;  %1922 = vmatpush.bf16.msra.mxu3 %v2865_v50  ;;  %v3242_v6 = vld [vmem:[%s4232_s28] ss:$0 sm:$0xff] }
 0x55c   : > { %v2889_v62 = vor.u32 %v3124_v63, %v2886_v60 }
 0x55d   : > { %v1659_v10 = vmul.f32 %v3961_v9, %v3961_v9  ;;  %1936 = vmatpush.bf16.msrb.mxu0 %v2869_v51 }
 0x55e   : > { %1949 = vmatpush.bf16.msra.mxu1 %v2889_v62 }
 0x55f   : > { %1661 = vadd.xlane.f32.xlu0 %v1659_v10  ;;  %v3120_v10 = vld [vmem:[%s3708_s18 + $0x6c] sm:$0xf]  ;;  %1923 = vmatpush.bf16.msra.mxu3 %v2849_v21  ;;  %v3154_v21 = vld [vmem:[%s3760_s29 + $0x78] sm:$0xff] }
 0x560   : > { %v1647_v11 = vpop.xlane.xlu1 %1646 }
 0x561   : > { %v1656_v12 = vmul.f32 %v3958_v8, %v1647_v11  ;;  %v2870_v11 = vld [vmem:[%s3708_s18 + $0x78] sm:$0xf0]  ;;  %1937 = vmatpush.bf16.msrb.mxu0 %v2853_v22  ;;  %v3160_v22 = vld [vmem:[%s3760_s29 + $0xa8] sm:$0xff] }
 0x563   : > { %v3966_v13 = vsub.f32 %v1641_v0, %v1656_v12  ;;  %v2860_v0 = vld [vmem:[%s3708_s18 + $0x60] sm:$0xf]  ;;  %v2873_v12 = vor.u32 %v3120_v10, %v2870_v11  ;;  %1924 = vmatpush.bf16.msra.mxu3 %v2833_v32 }
 0x564   : > { %v2861_v3 = vor.u32 %v3121_v1, %v2860_v0  ;;  %v3151_v32 = vld [vmem:[%s3760_s29 + $0x60] sm:$0xff] }
 0x565   : > { %v1660_v7 = vmul.f32 %v3966_v13, %v3966_v13  ;;  %1950 = vmatpush.bf16.msra.mxu1 %v2873_v12  ;;  %1938 = vmatpush.bf16.msrb.mxu0 %v2837_v33  ;;  %v3157_v33 = vld [vmem:[%s3760_s29 + $0x90] sm:$0xff] }
 0x566   : > { %1908 = vmatpush.bf16.msrb.mxu2 %v2861_v3 }
 0x567   : > { %1663 = vadd.xlane.f32.xlu2 %v1660_v7  ;;  %v2844_v7 = vld [vmem:[%s3708_s18 + $0x40] sm:$0xf]  ;;  %1925 = vmatpush.bf16.msra.mxu3 %v2817_v44 }
 0x568   : > { %v2845_v16 = vor.u32 %v3117_v14, %v2844_v7 }
 0x569   : > { %1951 = vmatpush.bf16.msra.mxu1 %v2857_v54  ;;  %1939 = vmatpush.bf16.msrb.mxu0 %v2821_v48  ;;  %v3153_v54 = vld [vmem:[%s3760_s29 + $0x70] sm:$0xff] }
 0x56a   : > { %1909 = vmatpush.bf16.msrb.mxu2 %v2845_v16  ;;  %v3170_v16 = vld [vmem:[%s3760_s29 + $0xf8] sm:$0xff] }
 0x56b   : > { %2310 = vmatpush.bf16.msrb.mxu3 %v3154_v21 }
 0x56d   : > { %1952 = vmatpush.bf16.msra.mxu1 %v2841_v38  ;;  %v3156_v38 = vld [vmem:[%s3760_s29 + $0x88] sm:$0xff] }
 0x56e   : > { %1910 = vmatpush.bf16.msrb.mxu2 %v2829_v28  ;;  %v3152_v28 = vld [vmem:[%s3760_s29 + $0x68] sm:$0xff] }
 0x56f   : > { %2311 = vmatpush.bf16.msrb.mxu3 %v3153_v54 }
 0x571   : > { %1953 = vmatpush.bf16.msra.mxu1 %v2825_v53  ;;  %v1737_v53 = vperm.slane %v4075_v35, 1 }
 0x572   : > { %1911 = vmatpush.bf16.msrb.mxu2 %v2813_v43  ;;  %v3149_v43 = vld [vmem:[%s3760_s29 + $0x50] sm:$0xff] }
 0x573   : > { %2312 = vmatpush.bf16.msrb.mxu3 %v3152_v28 }
 0x575   : > { %2338 = vmatpush.bf16.msrb.mxu1 %v3170_v16 }
 0x576   : > { %2296 = vmatpush.bf16.msra.mxu2 %v3146_v19 }
 0x577   : > { %2313 = vmatpush.bf16.msrb.mxu3 %v3151_v32 }
 0x579   : > { %2339 = vmatpush.bf16.msrb.mxu1 %v3169_v18 }
 0x57a   : > { %2297 = vmatpush.bf16.msra.mxu2 %v3145_v24 }
 0x57d   : > { %2340 = vmatpush.bf16.msrb.mxu1 %v3168_v23 }
 0x57e   : > { %2298 = vmatpush.bf16.msra.mxu2 %v3144_v27 }
 0x581   : > { %2341 = vmatpush.bf16.msrb.mxu1 %v3167_v26 }
 0x582   : > { %2299 = vmatpush.bf16.msra.mxu2 %v3143_v31 }
 0x585   : > { %2342 = vmatpush.bf16.msrb.mxu1 %v3166_v30 }
 0x586   : > { %2300 = vmatpush.bf16.msra.mxu2 %v3142_v36 }
 0x589   : > { %2343 = vmatpush.bf16.msrb.mxu1 %v3165_v34 }
 0x58d   : > { %2344 = vmatpush.bf16.msrb.mxu1 %v3164_v39 }
 0x591   : > { %2345 = vmatpush.bf16.msrb.mxu1 %v3163_v47 }
 0x5d2   : > { %v1662_v37 = vpop.xlane.xlu0 %1661 }
 0x5d3   : > { %v1665_v42 = vmul.f32 %v1662_v37, %v3958_v8  ;;  %v3150_v37 = vld [vmem:[%s3760_s29 + $0x58] sm:$0xff] }
 0x5d4   : > { %2314 = vmatpush.bf16.msrb.mxu3 %v3150_v37 }
 0x5d5   : > { %v1667_v52 = vadd.f32 1e-12, %v1665_v42  ;;  %v3141_v42 = vld [vmem:[%s3760_s29 + $0x10] sm:$0xff] }
 0x5d6   : > { %2301 = vmatpush.bf16.msra.mxu2 %v3141_v42 }
 0x5d7   : > { %3281 = vrsqrt.f32 %v1667_v52  ;;  %vm1675_vm9 = vweird.f32 %v1667_v52 }
 0x5d8   : > { %2315 = vmatpush.bf16.msrb.mxu3 %v3149_v43 }
 0x5da   : > { %v1664_v55 = vpop.xlane.xlu2 %1663 }
 0x5db   : > { %v1666_v56 = vmul.f32 %v1664_v55, %v3958_v8  ;;  %v3140_v55 = vld [vmem:[%s3760_s29 + $0x8] sm:$0xff] }
 0x5dc   : > { %2302 = vmatpush.bf16.msra.mxu2 %v3140_v55 }
 0x5dd   : > { %v3282_v57 = vpop.eup %3281  ;;  %v1668_v58 = vadd.f32 1e-12, %v1666_v56  ;;  %v3148_v56 = vld [vmem:[%s3760_s29 + $0x48] sm:$0xff] }
 0x5de   : > { %v1670_v59 = vmul.f32 %v3282_v57, %v1667_v52  ;;  %vm1676_vm8 = vweird.f32 %v3282_v57  ;;  %v1736_v52 = vperm.slane %v4075_v35, 0  ;;  %2316 = vmatpush.bf16.msrb.mxu3 %v3148_v56 }
 0x5df   : > { %3283 = vrsqrt.f32 %v1668_v58  ;;  %vm1677_vm10 = vmor %vm1675_vm9, %vm1676_vm8  ;;  %vm1685_vm12 = vweird.f32 %v1668_v58 }
 0x5e0   : > { %v1671_v20 = vmul.f32 %v3282_v57, %v1670_v59 }
 0x5e2   : > { %v1672_v61 = vmul.f32 0.5, %v1671_v20 }
 0x5e4   : > { %v1673_v63 = vsub.f32 1.5, %v1672_v61 }
 0x5e5   : > { %v3284_v60 = vpop.eup %3283 }
 0x5e6   : > { %v1674_v62 = vmul.f32 %v3282_v57, %v1673_v63  ;;  %v1680_v0 = vmul.f32 %v3284_v60, %v1668_v58  ;;  %vm1686_vm11 = vweird.f32 %v3284_v60 }
 0x5e7   : > { %vm1687_vm13 = vmor %vm1685_vm12, %vm1686_vm11 }
 0x5e8   : > { %v1681_v1 = vmul.f32 %v3284_v60, %v1680_v0  ;;  %v1678_v2 = vsel %vm1677_vm10, %v3282_v57, %v1674_v62  ;;  %v3139_v0 = vld [vmem:[%s3760_s29] sm:$0xff] }
 0x5e9   : > { %v1689_v5 = vmul.f32 %v1678_v2, %v3961_v9  ;;  %v3243_v9 = vld [vmem:[%s763_s1] ss:$0 sm:$0xff]  ;;  %2303 = vmatpush.bf16.msra.mxu2 %v3139_v0 }
 0x5ea   : > { %v1682_v3 = vmul.f32 0.5, %v1681_v1  ;;  %v3147_v1 = vld [vmem:[%s3760_s29 + $0x40] sm:$0xff] }
 0x5eb   : > { %v1694_v11 = vmul.f32 %v3242_v6, %v1689_v5  ;;  %2317 = vmatpush.bf16.msrb.mxu3 %v3147_v1 }
 0x5ec   : > { %v1683_v4 = vsub.f32 1.5, %v1682_v3 }
 0x5ed   : > { %v4048_v7 = vadd.f32 %v3243_v9, %v1694_v11 }
 0x5ee   : > { %v1684_v50 = vmul.f32 %v3284_v60, %v1683_v4 }
 0x5f0   : > { %v1688_v51 = vsel %vm1687_vm13, %v3284_v60, %v1684_v50 }
 0x5f1   : > { %v1690_v10 = vmul.f32 %v1688_v51, %v3966_v13  ;;  %v3162_v13 = vld [vmem:[%s3760_s29 + $0xb8] sm:$0xff] }
 0x5f2   : > { %2324 = vmatpush.bf16.msra.mxu0 %v3162_v13 }
 0x5f3   : > { %v1695_v12 = vmul.f32 %v3242_v6, %v1690_v10 }
 0x5f5   : > { %v4050_v14 = vadd.f32 %v3243_v9, %v1695_v12 }
 0x5f6   : > { %2325 = vmatpush.bf16.msra.mxu0 %v3161_v17 }
 0x5f7   : > { %v1701_v15 = vpack.c.bf16 %v4050_v14, %v4048_v7 }
 0x5f9   : > { %1912 = vmatmul.bf16.vlgmr.msrb.gmra.mxu2 %v1701_v15  ;;  %1926 = vmatmul.bf16.vlgmr.msra.gmra.mxu3 %v1701_v15 }
 0x5fa   : > { %1940 = vmatmul.bf16.vlgmr.msrb.gmra.mxu0 %v1701_v15  ;;  %1954 = vmatmul.bf16.vlgmr.msra.gmra.mxu1 %v1701_v15 }
 0x5fb   : > { %2326 = vmatpush.bf16.msra.mxu0 %v3160_v22 }
 0x5ff   : > { %2327 = vmatpush.bf16.msra.mxu0 %v3159_v25 }
 0x603   : > { %2328 = vmatpush.bf16.msra.mxu0 %v3158_v29 }
 0x607   : > { %2329 = vmatpush.bf16.msra.mxu0 %v3157_v33 }
 0x60b   : > { %2330 = vmatpush.bf16.msra.mxu0 %v3156_v38 }
 0x60f   : > { %2331 = vmatpush.bf16.msra.mxu0 %v3155_v46 }
 0x677   : > { %v1941_v44 = vpop.f32.mrf.mxu0  ;;  %v1955_v45 = vpop.f32.mrf.mxu1 }
 0x678   : > { %v4087_v48 = vadd.f32 %v1941_v44, %v1738_v40  ;;  %v4089_v49 = vadd.f32 %v1955_v45, %v1739_v41 }
 0x67a   : > { %v1962_v57 = vmul.f32 %v4087_v48, %v4087_v48  ;;  %v1963_v58 = vmul.f32 %v4089_v49, %v4089_v49 }
 0x67c   : > { %v1970_v59 = vmul.f32 %v1962_v57, %v4087_v48  ;;  %v1971_v20 = vmul.f32 %v1963_v58, %v4089_v49  ;;  %v1913_v61 = vpop.f32.mrf.mxu2  ;;  %v1927_v63 = vpop.f32.mrf.mxu3 }
 0x67d   : > { %v4101_v60 = vadd.f32 %v1913_v61, %v1736_v52  ;;  %v4103_v62 = vadd.f32 %v1927_v63, %v1737_v53 }
 0x67e   : > { %v1978_v2 = vmul.f32 0.044715, %v1970_v59  ;;  %v1979_v3 = vmul.f32 0.044715, %v1971_v20 }
 0x67f   : > { %v1960_v4 = vmul.f32 %v4101_v60, %v4101_v60  ;;  %v1961_v5 = vmul.f32 %v4103_v62, %v4103_v62  ;;  %v1943_v6 = vpop.f32.mrf.mxu0  ;;  %v1957_v50 = vpop.f32.mrf.mxu1 }
 0x680   : > { %v1986_v51 = vadd.f32 %v1978_v2, %v4087_v48  ;;  %v1987_v10 = vadd.f32 %v1979_v3, %v4089_v49  ;;  %v1944_v11 = vadd.f32 %v1943_v6, %v1738_v40  ;;  %v4113_v9 = vadd.f32 %v1957_v50, %v1739_v41 }
 0x681   : > { %v1968_v12 = vmul.f32 %v1960_v4, %v4101_v60  ;;  %v1969_v15 = vmul.f32 %v1961_v5, %v4103_v62 }
 0x682   : > { %v1994_v13 = vmul.f32 0.7978846, %v1986_v51  ;;  %v1966_v16 = vmul.f32 %v1944_v11, %v1944_v11  ;;  %v1967_v17 = vmul.f32 %v4113_v9, %v4113_v9  ;;  %v1995_v18 = vmul.f32 0.7978846, %v1987_v10 }
 0x683   : > { %v1976_v19 = vmul.f32 0.044715, %v1968_v12  ;;  %v1977_v21 = vmul.f32 0.044715, %v1969_v15 }
 0x684   : > { %v1974_v22 = vmul.f32 %v1966_v16, %v1944_v11  ;;  %v1975_v23 = vmul.f32 %v1967_v17, %v4113_v9  ;;  %v1915_v24 = vpop.f32.mrf.mxu2  ;;  %v1929_v54 = vpop.f32.mrf.mxu3  ;;  %3285 = vtanh.f32 %v1994_v13 }
 0x685   : > { %v1984_v25 = vadd.f32 %v1976_v19, %v4101_v60  ;;  %v1985_v26 = vadd.f32 %v1977_v21, %v4103_v62  ;;  %v1916_v27 = vadd.f32 %v1915_v24, %v1736_v52  ;;  %v1930_v30 = vadd.f32 %v1929_v54, %v1737_v53 }
 0x686   : > { %v1982_v28 = vmul.f32 0.044715, %v1974_v22  ;;  %v1983_v29 = vmul.f32 0.044715, %v1975_v23  ;;  %3287 = vtanh.f32 %v1995_v18 }
 0x687   : > { %v1992_v31 = vmul.f32 0.7978846, %v1984_v25  ;;  %v1993_v32 = vmul.f32 0.7978846, %v1985_v26  ;;  %v1964_v33 = vmul.f32 %v1916_v27, %v1916_v27  ;;  %v1965_v36 = vmul.f32 %v1930_v30, %v1930_v30 }
 0x688   : > { %v1990_v34 = vadd.f32 %v1982_v28, %v1944_v11  ;;  %v1991_v35 = vadd.f32 %v1983_v29, %v4113_v9 }
 0x689   : > { %v1972_v37 = vmul.f32 %v1964_v33, %v1916_v27  ;;  %3289 = vtanh.f32 %v1992_v31  ;;  %v1973_v40 = vmul.f32 %v1965_v36, %v1930_v30 }
 0x68a   : > { %v1998_v38 = vmul.f32 0.7978846, %v1990_v34  ;;  %v1999_v39 = vmul.f32 0.7978846, %v1991_v35  ;;  %3291 = vtanh.f32 %v1993_v32  ;;  %v3286_v42 = vpop.eup %3285 }
 0x68b   : > { %v1980_v41 = vmul.f32 0.044715, %v1972_v37  ;;  %v1981_v43 = vmul.f32 0.044715, %v1973_v40  ;;  %v2010_v47 = vadd.f32 1.0, %v3286_v42 }
 0x68c   : > { %3293 = vtanh.f32 %v1998_v38  ;;  %v3288_v44 = vpop.eup %3287 }
 0x68d   : > { %3295 = vtanh.f32 %v1999_v39  ;;  %v1988_v45 = vadd.f32 %v1980_v41, %v1916_v27  ;;  %v1989_v46 = vadd.f32 %v1981_v43, %v1930_v30  ;;  %v2011_v55 = vadd.f32 1.0, %v3288_v44 }
 0x68e   : > { %v2018_v20 = vmul.f32 0.5, %v2010_v47 }
 0x68f   : > { %v1996_v52 = vmul.f32 0.7978846, %v1988_v45  ;;  %v3290_v53 = vpop.eup %3289  ;;  %v1997_v56 = vmul.f32 0.7978846, %v1989_v46  ;;  %v2019_v63 = vmul.f32 0.5, %v2011_v55 }
 0x690   : > { %v3292_v57 = vpop.eup %3291  ;;  %v2008_v0 = vadd.f32 1.0, %v3290_v53  ;;  %v2026_v6 = vmul.f32 %v2018_v20, %v4087_v48 }
 0x691   : > { %3297 = vtanh.f32 %v1996_v52  ;;  %v2009_v2 = vadd.f32 1.0, %v3292_v57  ;;  %v2027_v10 = vmul.f32 %v2019_v63, %v4089_v49 }
 0x692   : > { %v3294_v58 = vpop.eup %3293  ;;  %3299 = vtanh.f32 %v1997_v56  ;;  %v2016_v12 = vmul.f32 0.5, %v2008_v0 }
 0x693   : > { %v3296_v59 = vpop.eup %3295  ;;  %v2014_v61 = vadd.f32 1.0, %v3294_v58  ;;  %v2017_v16 = vmul.f32 0.5, %v2009_v2 }
 0x694   : > { %v2015_v1 = vadd.f32 1.0, %v3296_v59  ;;  %v2024_v23 = vmul.f32 %v2016_v12, %v4101_v60 }
 0x695   : > { %v2022_v3 = vmul.f32 0.5, %v2014_v61  ;;  %v2025_v48 = vmul.f32 %v2017_v16, %v4103_v62 }
 0x696   : > { %v2023_v4 = vmul.f32 0.5, %v2015_v1 }
 0x697   : > { %v3298_v5 = vpop.eup %3297  ;;  %v2030_v50 = vmul.f32 %v2022_v3, %v1944_v11  ;;  %v3245_v3 = vld [vmem:[%s773_s5] ss:$0 sm:$0xff] }
 0x698   : > { %v3300_v51 = vpop.eup %3299  ;;  %v2031_v15 = vmul.f32 %v2023_v4, %v4113_v9  ;;  %v2012_v13 = vadd.f32 1.0, %v3298_v5  ;;  %v3244_v9 = vld [vmem:[%s770_s17] ss:$0 sm:$0xff] }
 0x699   : > { %v2013_v17 = vadd.f32 1.0, %v3300_v51  ;;  %v2034_v18 = vpack.c.bf16 %v2030_v50, %v2026_v6  ;;  %v3246_v5 = vld [vmem:[%s776_s11] ss:$0 sm:$0xff] }
 0x69a   : > { %v2020_v19 = vmul.f32 0.5, %v2012_v13  ;;  %v2035_v21 = vpack.c.bf16 %v2031_v15, %v2027_v10 }
 0x69b   : > { %v2021_v22 = vmul.f32 0.5, %v2013_v17  ;;  %2332 = vmatmul.bf16.vlgmr.msra.gmra.mxu0 %v2034_v18 }
 0x69c   : > { %v2028_v24 = vmul.f32 %v2020_v19, %v1916_v27  ;;  %2346 = vmatmul.bf16.vlgmr.msrb.gmra.mxu1 %v2035_v21 }
 0x69d   : > { %v2029_v11 = vmul.f32 %v2021_v22, %v1930_v30 }
 0x69e   : > { %v2032_v49 = vpack.c.bf16 %v2028_v24, %v2024_v23 }
 0x69f   : > { %v2033_v54 = vpack.c.bf16 %v2029_v11, %v2025_v48 }
 0x6a0   : > { %2304 = vmatmul.bf16.vlgmr.msra.gmra.mxu2 %v2032_v49 }
 0x6a1   : > { %2318 = vmatmul.bf16.vlgmr.msrb.gmra.mxu3 %v2033_v54 }
 0x718   : > { %v2333_v29 = vpop.f32.mrf.mxu0 }
 0x719   : > { %v2347_v60 = vpop.f32.mrf.mxu1 }
 0x720   : > { %v2335_v36 = vpop.f32.mrf.mxu0 }
 0x721   : > { %v2349_v38 = vpop.f32.mrf.mxu1 }
 0x723   : > { %v2305_v25 = vpop.f32.mrf.mxu2 }
 0x724   : > { %v2306_v26 = vadd.f32 %v3244_v9, %v2305_v25  ;;  %v2319_v28 = vpop.f32.mrf.mxu3 }
 0x726   : > { %v2320_v31 = vadd.f32 %v2319_v28, %v2306_v26 }
 0x728   : > { %v2334_v27 = vadd.f32 %v2333_v29, %v2320_v31 }
 0x72a   : > { %v2348_v32 = vadd.f32 %v2347_v60, %v2334_v27 }
 0x72b   : > { %v2307_v33 = vpop.f32.mrf.mxu2 }
 0x72c   : > { %v2308_v62 = vadd.f32 %v3244_v9, %v2307_v33  ;;  %v2352_v30 = vadd.f32 %v2348_v32, %v4048_v7  ;;  %v2321_v34 = vpop.f32.mrf.mxu3 }
 0x72e   : > { %v2322_v35 = vadd.f32 %v2321_v34, %v2308_v62  ;;  %2356 = vadd.xlane.f32.xlu1 %v2352_v30 }
 0x730   : > { %v2336_v37 = vadd.f32 %v2335_v36, %v2322_v35 }
 0x732   : > { %v2350_v39 = vadd.f32 %v2349_v38, %v2336_v37 }
 0x734   : > { %v2353_v40 = vadd.f32 %v2350_v39, %v4050_v14 }
 0x736   : > { %2358 = vadd.xlane.f32.xlu0 %v2353_v40 }
 0x7a1   : > { %v2357_v41 = vpop.xlane.xlu1 %2356 }
 0x7a2   : > { %v2360_v42 = vmul.f32 %v2357_v41, %v3958_v8 }
 0x7a4   : > { %v2362_v43 = vsub.f32 %v2352_v30, %v2360_v42 }
 0x7a6   : > { %v2364_v44 = vmul.f32 %v2362_v43, %v2362_v43 }
 0x7a8   : > { %2366 = vadd.xlane.f32.xlu2 %v2364_v44 }
 0x7a9   : > { %v2359_v45 = vpop.xlane.xlu0 %2358 }
 0x7aa   : > { %v2361_v46 = vmul.f32 %v2359_v45, %v3958_v8 }
 0x7ac   : > { %v2363_v7 = vsub.f32 %v2353_v40, %v2361_v46 }
 0x7ae   : > { %v2365_v47 = vmul.f32 %v2363_v7, %v2363_v7 }
 0x7b0   : > { %2368 = vadd.xlane.f32.xlu1 %v2365_v47 }
 0x81b   : > { %v2367_v52 = vpop.xlane.xlu2 %2366 }
 0x81c   : > { %v2370_v53 = vmul.f32 %v2367_v52, %v3958_v8 }
 0x81e   : > { %v2372_v55 = vadd.f32 1e-12, %v2370_v53 }
 0x820   : > { %3301 = vrsqrt.f32 %v2372_v55  ;;  %vm2380_vm15 = vweird.f32 %v2372_v55 }
 0x823   : > { %v2369_v14 = vpop.xlane.xlu1 %2368 }
 0x824   : > { %v2371_v56 = vmul.f32 %v2369_v14, %v3958_v8 }
 0x826   : > { %v3302_v57 = vpop.eup %3301  ;;  %v2373_v58 = vadd.f32 1e-12, %v2371_v56 }
 0x827   : > { %v2375_v59 = vmul.f32 %v3302_v57, %v2372_v55  ;;  %vm2381_vm14 = vweird.f32 %v3302_v57 }
 0x828   : > { %3303 = vrsqrt.f32 %v2373_v58  ;;  %vm2382_vm0 = vmor %vm2380_vm15, %vm2381_vm14  ;;  %vm2390_vm2 = vweird.f32 %v2373_v58 }
 0x829   : > { %v2376_v20 = vmul.f32 %v3302_v57, %v2375_v59 }
 0x82b   : > { %v2377_v61 = vmul.f32 0.5, %v2376_v20 }
 0x82d   : > { %v2378_v63 = vsub.f32 1.5, %v2377_v61 }
 0x82e   : > { %v3304_v0 = vpop.eup %3303 }
 0x82f   : > { %v2379_v1 = vmul.f32 %v3302_v57, %v2378_v63  ;;  %v2385_v2 = vmul.f32 %v3304_v0, %v2373_v58  ;;  %vm2391_vm1 = vweird.f32 %v3304_v0 }
 0x830   : > { %vm2392_vm3 = vmor %vm2390_vm2, %vm2391_vm1 }
 0x831   : > { %v2383_v8 = vsel %vm2382_vm0, %v3302_v57, %v2379_v1  ;;  %v2386_v4 = vmul.f32 %v3304_v0, %v2385_v2 }
 0x832   : > { %v2394_v6 = vmul.f32 %v2383_v8, %v2362_v43 }
 0x833   : > { %v2387_v50 = vmul.f32 0.5, %v2386_v4 }
 0x834   : > { %v2399_v51 = vmul.f32 %v3245_v3, %v2394_v6 }
 0x835   : > { %v2388_v10 = vsub.f32 1.5, %v2387_v50 }
 0x836   : > { %v2404_v12 = vadd.f32 %v3246_v5, %v2399_v51 }
 0x837   : > { %v2389_v15 = vmul.f32 %v3304_v0, %v2388_v10 }
 0x838   : > { %2406 = vst [vmem:[#allocation2] sm:$0xff] %v2404_v12 }
 0x839   : > { %v2393_v13 = vsel %vm2392_vm3, %v3304_v0, %v2389_v15 }
 0x83a   : > { %v2395_v16 = vmul.f32 %v2393_v13, %v2363_v7 }
 0x83c   : > { %v2400_v17 = vmul.f32 %v3245_v3, %v2395_v16  ;;  %2411 = sbr.rel (%p3066_p10) target bundleno = 2261 (0x8d5), region = 124 }
 0x83e   : > { %v2405_v18 = vadd.f32 %v3246_v5, %v2400_v17 }
 0x840   : > { %2407 = vst [vmem:[#allocation2 + $0x8] sm:$0xff] %v2405_v18 }
 0x841   : > { %v3305_v21 = vld [vmem:[%s4236_s14] ss:$0 sm:$0xff]  ;;  %vm2418_vm4 = vcmask 1041408   ;;  %v3306_v24 = vld [vmem:[#allocation4] ss:$0 sm:$0xff]  ;;  %vm2427_vm5 = vcmask 1024  }
 0x842   : > { %v2429_v11 = vld [vmem:[%s4237_s26] sm:$0x3]  ;;  %vm2440_vm6 = vcmask 0  }
 0x847   : > { %v2412_v19 = vld [vmem:[#allocation2] ss:$8 sm:$0x3] }
 0x848   : > { %v2417_v22 = vmul.f32 %v3305_v21, %v2412_v19 }
 0x84a   : > { %v2419_v23 = vsel %vm2418_vm4, %v2417_v22, 0.0 }
 0x84b   : > { %2420 = vadd.xlane.f32.xlu0 %v2419_v23 }
 0x8be   : > { %v2421_v48 = vpop.xlane.xlu0 %2420 }
 0x8bf   : > { %v2426_v49 = vadd.f32 %v3306_v24, %v2421_v48 }
 0x8c1   : > { %2428 = vst.msk [vmem:[%s4238_s21] sm:$0x3] %vm2427_vm5, %v2426_v49  ;;  %v2430_v54 = vsub.f32 %v2426_v49, %v2429_v11 }
 0x8c3   : > { %v2431_v9 = vmul.f32 %v2430_v54, %v2430_v54 }
 0x8c5   : > { %v2432_v25 = vsel %vm2427_vm5, %v2431_v9, 0.0 }
 0x8c6   : > { %v2433_v26 = vrot.slane %v2432_v25, 4 }
 0x8c8   : > { %v2434_v28 = vadd.f32 %v2433_v26, %v2432_v25 }
 0x8ca   : > { %v2435_v29 = vrot.slane %v2434_v28, 2 }
 0x8cc   : > { %v2436_v31 = vadd.f32 %v2435_v29, %v2434_v28 }
 0x8ce   : > { %v2437_v60 = vrot.slane %v2436_v31, 1 }
 0x8d0   : > { %v2438_v27 = vadd.f32 %v2437_v60, %v2436_v31 }
 0x8d2   : > { %v2439_v32 = vmul.f32 0.5, %v2438_v27 }
 0x8d4   : > { %2441 = vst.msk [vmem:[#allocation11] sm:$0x1] %vm2440_vm6, %v2439_v32 }
 0x8d5 PF: > { %p3196_p5 = scmp.eq.s32.totalorder %s3599_s16, 1  ;;  %s3481_s20 = smov [#allocation11]  }
 0x8d6   : > { %s2451_s18 = sshll.u32 %s3481_s20, 4  ;;  %s4239_s15 = sld [smem:[#allocation34_spill]]  ;;  %s2452_s18 = int_to_ptr.vmem [resolvable:$true] %s2451_s18 }
 0x8dc   : > { %s2453_s9 = sshll.u32 %s4239_s15, 4  ;;  %s2454_s9 = int_to_ptr.hbm [resolvable:$true] %s2453_s9 }
 0x8dd   : > { %3182 = dma.vmem_to_hbm [thread:$0]  (%p3196_p5), %s2452_s18, 16, %s2454_s9, [#allocation7]  }
 0x8de   : > { %3452 = dma.done.wait (%p3196_p5), [#allocation7], 16  }
 0x8df   : > { %3454 = vsyncadd (%p3196_p5), [#allocation7], 4294967280 }
 0x8e0 PF: > { %s4240_s19 = sld [smem:[#allocation19_spill]]  ;;  %s4243_s29 = smov %s3461_s30 }
 0x8e1   : > { %s4241_s3 = sld [smem:[#allocation18_spill]] }
 0x8e2   : > { %s4242_s0 = sld [smem:[#allocation20_spill]] }
 0x8e6   : > { %p35_p13 = scmp.ge.s32.totalorder %s4240_s19, 4  }
 0x8e7   : > { %s4244_s30 = smov %s4241_s3 }
 0x8e8   :  { %37 = sbr.rel (!%p35_p13) target bundleno = 21 (0x15), region = 212 }
 0x8ed   :  { %2470 = vsyncpa [#allocation6], 1 }
 0x8ee   :  { %2472 = vsyncpa [#allocation6 + $0x1], 1 }
 0x8ef   :  { %2473 = vsyncpa [#allocation9], 1 }
 0x8f0   :  { %2475 = vsyncpa [#allocation9 + $0x1], 1 }
 0x8f1   :  { %2476 = vsyncpa [#allocation7], 1 }
 0x8f2   :  { %2478 = vsyncpa [#allocation7 + $0x1], 1 }

</bundles_post_ra>
